<compile_context>
chip_gen: v6e
topology: v6e:2x2x1
jax: 0.10.0
libtpu: 0.0.40
codegen_flags: <defaults>
</compile_context>

<pallas_src>
import functools
import math

import jax
import jax.numpy as jnp
from jax import lax
from jax.experimental import pallas as pl
from jax.experimental.pallas import tpu as pltpu


# Row indices inside the packed per-layer "vecs" buffer ([8, Fout]).
ROW_WE = 0       # lin_edge weight (edge_dim == 1, no bias)
ROW_GAMMA = 1    # LayerNorm weight
ROW_BETA = 2     # LayerNorm bias
ROW_WB_A = 3     # folded beta weight applied to `out`  (= wb_out + wb_diff)
ROW_WB_B = 4     # folded beta weight applied to `x_r`  (= wb_skip - wb_diff)


def gtn_fused_kernel(x_ref, adj_ref, ea_ref, *rest, layer_meta):
    """All TransformerConv layers of the GTN forward, fused into one kernel.

    rest = (w0, b0, vec0, w1, b1, vec1, ..., out_ref)
      w_i   : [Fin_i, 4*Fout_i]   packed [Wq | Wk | Wv | Wskip]
      b_i   : [1, 4*Fout_i]       packed [bq | bk | bv | bskip]
      vec_i : [8, Fout_i]         rows: we, gamma, beta_ln, wb_a, wb_b (rest zero)
    layer_meta: static tuple of (out_dim, apply_ln_relu) per layer.
    """
    out_ref = rest[-1]
    params = rest[:-1]

    adj = adj_ref[...]                  # [N, N]  adj[dst, src]
    ea = ea_ref[...]                    # [N, N]  ea[dst, src]
    mask = adj > 0

    h = x_ref[...]                      # [N, Fin]
    for i, (fout, apply_ln_relu) in enumerate(layer_meta):
        w_ref = params[3 * i]
        b_ref = params[3 * i + 1]
        vec_ref = params[3 * i + 2]

        # --- single packed projection (MXU): [q | k | v | x_r], lane-dense 4*Fout output ---
        proj = jnp.dot(h, w_ref[...], preferred_element_type=jnp.float32) + b_ref[...]
        q = proj[:, 0 * fout:1 * fout]
        k = proj[:, 1 * fout:2 * fout]
        v = proj[:, 2 * fout:3 * fout]
        x_r = proj[:, 3 * fout:4 * fout]

        vecs = vec_ref[...]
        we = vecs[ROW_WE:ROW_WE + 1, :]              # [1, Fout]
        gamma = vecs[ROW_GAMMA:ROW_GAMMA + 1, :]
        beta_ln = vecs[ROW_BETA:ROW_BETA + 1, :]
        wb_a = vecs[ROW_WB_A:ROW_WB_A + 1, :]
        wb_b = vecs[ROW_WB_B:ROW_WB_B + 1, :]

        # --- edge-augmented attention logits ---
        # logits[d, s] = q[d] . (k[s] + ea[d,s] * we) / sqrt(Fout)
        #             = (q @ k^T)[d,s]/sqrt + (q @ we^T)[d] * ea[d,s]/sqrt
        scale = jnp.float32(1.0 / math.sqrt(fout))
        qk = lax.dot_general(q, k, (((1,), (1,)), ((), ())),
                             preferred_element_type=jnp.float32)        # [N, N]
        qe = lax.dot_general(q, we, (((1,), (1,)), ((), ())),
                             preferred_element_type=jnp.float32)        # [N, 1]
        logits = (qk + qe * ea) * scale

        # --- masked softmax over sources (per-destination edge softmax) ---
        masked = jnp.where(mask, logits, jnp.float32(-1e30))
        m = jnp.max(masked, axis=-1, keepdims=True)
        p = jnp.where(mask, jnp.exp(masked - m), 0.0)
        denom = jnp.sum(p, axis=-1, keepdims=True)
        alpha = p * pl.reciprocal(jnp.maximum(denom, 1e-16), approx=True)

        # --- weighted aggregation of (value + edge) messages ---
        # out[d] = sum_s alpha[d,s] * (v[s] + ea[d,s] * we)
        out = jnp.dot(alpha, v, preferred_element_type=jnp.float32)
        out = out + jnp.sum(alpha * ea, axis=-1, keepdims=True) * we

        # --- beta-gated skip connection (folded lin_beta) ---
        b_logit = jnp.sum(out * wb_a + x_r * wb_b, axis=-1, keepdims=True)
        b = jax.nn.sigmoid(b_logit)                  # [N, 1]
        h = b * x_r + (1.0 - b) * out

        # --- fused LayerNorm + ReLU (all layers except the last) ---
        if apply_ln_relu:
            mu = jnp.mean(h, axis=-1, keepdims=True)
            var = jnp.mean((h - mu) * (h - mu), axis=-1, keepdims=True)
            h = (h - mu) * lax.rsqrt(var + 1e-5)
            h = h * gamma + beta_ln
            h = jnp.maximum(h, 0.0)
        # TODO(synk): dropout is a no-op in eval mode; training-mode dropout not implemented.

    # TODO(synk): if N grows large, replace the dense [N,N] adj/ea path with source-tiled
    # online softmax (flash-style) and bf16 MXU inputs; unnecessary at these toy sizes.
    out_ref[...] = h


def pack_layer_params(p):
    """Pack per-PyG-structure params into (W_packed, b_packed, vecs) for the fused kernel.

    Column order of the packed projection is [Wq | Wk | Wv | Wskip]; lin_beta (Linear(3F,1,
    bias=False) applied to concat([out, x_r, out - x_r])) is folded into two row vectors:
      wb_a = wb_out + wb_diff (applied to out), wb_b = wb_skip - wb_diff (applied to x_r).
    """
    fout = p["wq"].shape[1]
    w_packed = jnp.concatenate([p["wq"], p["wk"], p["wv"], p["wskip"]], axis=1)
    b_packed = jnp.concatenate([p["bq"], p["bk"], p["bv"], p["bskip"]], axis=1)
    vecs = jnp.zeros((8, fout), jnp.float32)
    vecs = vecs.at[ROW_WE].set(p["we"][0])
    vecs = vecs.at[ROW_GAMMA].set(p["gamma"][0])
    vecs = vecs.at[ROW_BETA].set(p["betaln"][0])
    vecs = vecs.at[ROW_WB_A].set((p["wb_out"] + p["wb_diff"])[:, 0])
    vecs = vecs.at[ROW_WB_B].set((p["wb_skip"] - p["wb_diff"])[:, 0])
    return w_packed, b_packed, vecs


def gtn_forward(x, adj, ea, layer_params, num_layers):
    """Whole GTN forward as a single fused pallas_call (h never leaves VMEM between layers)."""
    N = x.shape[0]
    flat_inputs = [x, adj, ea]
    layer_meta = []
    for i, p in enumerate(layer_params):
        w_packed, b_packed, vecs = pack_layer_params(p)
        flat_inputs += [w_packed, b_packed, vecs]
        layer_meta.append((w_packed.shape[1] // 4, i < num_layers - 1))
    out_dim = layer_meta[-1][0]

    kernel = functools.partial(gtn_fused_kernel, layer_meta=tuple(layer_meta))
    return pl.pallas_call(
        kernel,
        out_shape=jax.ShapeDtypeStruct((N, out_dim), jnp.float32),
        in_specs=[pl.BlockSpec(memory_space=pltpu.MemorySpace.VMEM)] * len(flat_inputs),
        out_specs=pl.BlockSpec(memory_space=pltpu.MemorySpace.VMEM),
    )(*flat_inputs)
    # TODO(synk): for batched-graph inference add a leading grid axis over the batch with
    # dimension_semantics=("parallel",) so v7x's 2 TensorCores both get work.


def init_layer_params(key, in_dim, out_dim):
    """Deterministic synthetic parameters for one TransformerConv (+ LayerNorm)."""
    ks = jax.random.split(key, 10)
    s = 0.1
    return {
        "wq": jax.random.normal(ks[0], (in_dim, out_dim), jnp.float32) * s,
        "bq": jax.random.normal(ks[1], (1, out_dim), jnp.float32) * s,
        "wk": jax.random.normal(ks[2], (in_dim, out_dim), jnp.float32) * s,
        "bk": jax.random.normal(ks[3], (1, out_dim), jnp.float32) * s,
        "wv": jax.random.normal(ks[4], (in_dim, out_dim), jnp.float32) * s,
        "bv": jax.random.normal(ks[5], (1, out_dim), jnp.float32) * s,
        "we": jax.random.normal(ks[6], (1, out_dim), jnp.float32) * s,      # lin_edge (edge_dim=1, no bias)
        "wskip": jax.random.normal(ks[7], (in_dim, out_dim), jnp.float32) * s,
        "bskip": jax.random.normal(ks[8], (1, out_dim), jnp.float32) * s,
        # lin_beta: Linear(3*out_dim, 1, bias=False) split into its three column blocks
        "wb_out": jax.random.normal(ks[9], (out_dim, 1), jnp.float32) * s,
        "wb_skip": jax.random.normal(jax.random.fold_in(key, 100), (out_dim, 1), jnp.float32) * s,
        "wb_diff": jax.random.normal(jax.random.fold_in(key, 101), (out_dim, 1), jnp.float32) * s,
        # LayerNorm params (ones/zeros == torch reset_parameters); unused/dummy on the last layer
        "gamma": jnp.ones((1, out_dim), jnp.float32),
        "betaln": jnp.zeros((1, out_dim), jnp.float32),
    }


if __name__ == "__main__":
    # Small shapes implied by the module: N nodes, input_dim features, 1-D edge attrs.
    N = 16
    input_dim = 8
    hidden_dim = 32
    output_dim = 16
    num_layers = 3
    E = 40

    root = jax.random.PRNGKey(0)
    kx, ke, ka, kp = jax.random.split(root, 4)

    # Node features
    x = jax.random.normal(kx, (N, input_dim), jnp.float32)

    # Graph: unique directed edges (src -> dst), scalar edge attributes
    edge_ids = jax.random.choice(ke, N * N, shape=(E,), replace=False)
    src = edge_ids % N
    dst = edge_ids // N
    edge_attr = jax.random.normal(ka, (E, 1), jnp.float32)

    # Densify (glue, plain JAX): adj[dst, src] mask and dense edge-attr matrix
    adj = jnp.zeros((N, N), jnp.float32).at[dst, src].set(1.0)
    ea = jnp.zeros((N, N), jnp.float32).at[dst, src].set(edge_attr[:, 0])

    # Parameters: layer 0: input->hidden, middle: hidden->hidden, last: hidden->output
    dims = [(input_dim, hidden_dim)] + \
           [(hidden_dim, hidden_dim)] * (num_layers - 2) + \
           [(hidden_dim, output_dim)]
    layer_keys = jax.random.split(kp, num_layers)
    layer_params = [init_layer_params(layer_keys[i], fin, fout)
                    for i, (fin, fout) in enumerate(dims)]

    out = gtn_forward(x, adj, ea, layer_params, num_layers)
    out = jax.block_until_ready(out)

    assert out.shape == (N, output_dim)
    assert bool(jnp.all(jnp.isfinite(out)))
    print("KERNEL_OK")
</pallas_src>

<mosaic_0001>
module attributes {stable_mosaic.version = 11 : i64} {
  func.func @gtn_fused_kernel(%arg0: memref<16x8xf32, #tpu.memory_space<vmem>>, %arg1: memref<16x16xf32, #tpu.memory_space<vmem>>, %arg2: memref<16x16xf32, #tpu.memory_space<vmem>>, %arg3: memref<8x128xf32, #tpu.memory_space<vmem>>, %arg4: memref<1x128xf32, #tpu.memory_space<vmem>>, %arg5: memref<8x32xf32, #tpu.memory_space<vmem>>, %arg6: memref<32x128xf32, #tpu.memory_space<vmem>>, %arg7: memref<1x128xf32, #tpu.memory_space<vmem>>, %arg8: memref<8x32xf32, #tpu.memory_space<vmem>>, %arg9: memref<32x64xf32, #tpu.memory_space<vmem>>, %arg10: memref<1x64xf32, #tpu.memory_space<vmem>>, %arg11: memref<8x16xf32, #tpu.memory_space<vmem>>, %arg12: memref<16x16xf32, #tpu.memory_space<vmem>>) attributes {dimension_semantics = [], scalar_prefetch = 0 : i64, scratch_operands = 0 : i64, tpu.core_type = #tpu.core_type<tc>} {
    %c0 = arith.constant 0 : index
    %c0_0 = arith.constant 0 : index
    %0 = vector.load %arg1[%c0, %c0_0] : memref<16x16xf32, #tpu.memory_space<vmem>>, vector<16x16xf32>
    %c0_1 = arith.constant 0 : index
    %c0_2 = arith.constant 0 : index
    %1 = vector.load %arg2[%c0_1, %c0_2] : memref<16x16xf32, #tpu.memory_space<vmem>>, vector<16x16xf32>
    %cst = arith.constant 0.000000e+00 : f32
    %2 = vector.broadcast %cst : f32 to vector<16x16xf32>
    %3 = arith.cmpf ogt, %0, %2 : vector<16x16xf32>
    %c0_3 = arith.constant 0 : index
    %c0_4 = arith.constant 0 : index
    %4 = vector.load %arg0[%c0_3, %c0_4] : memref<16x8xf32, #tpu.memory_space<vmem>>, vector<16x8xf32>
    %c0_5 = arith.constant 0 : index
    %c0_6 = arith.constant 0 : index
    %5 = vector.load %arg3[%c0_5, %c0_6] : memref<8x128xf32, #tpu.memory_space<vmem>>, vector<8x128xf32>
    %cst_7 = arith.constant dense<0.000000e+00> : vector<16x128xf32>
    %6 = tpu.matmul %4, %5, %cst_7 {dimension_numbers = #tpu.dot_dimension_numbers<[1], [0], [0], [1], [0, 0, 1, 1], [], []>} : vector<16x8xf32>, vector<8x128xf32>, vector<16x128xf32> -> vector<16x128xf32>
    %c0_8 = arith.constant 0 : index
    %c0_9 = arith.constant 0 : index
    %7 = vector.load %arg4[%c0_8, %c0_9] : memref<1x128xf32, #tpu.memory_space<vmem>>, vector<1x128xf32>
    %8 = vector.broadcast %7 : vector<1x128xf32> to vector<16x128xf32>
    %9 = arith.addf %6, %8 : vector<16x128xf32>
    %10 = vector.extract_strided_slice %9 {offsets = [0, 0], sizes = [16, 32], strides = [1, 1]} : vector<16x128xf32> to vector<16x32xf32>
    %11 = vector.extract_strided_slice %9 {offsets = [0, 32], sizes = [16, 32], strides = [1, 1]} : vector<16x128xf32> to vector<16x32xf32>
    %12 = vector.extract_strided_slice %9 {offsets = [0, 64], sizes = [16, 32], strides = [1, 1]} : vector<16x128xf32> to vector<16x32xf32>
    %13 = vector.extract_strided_slice %9 {offsets = [0, 96], sizes = [16, 32], strides = [1, 1]} : vector<16x128xf32> to vector<16x32xf32>
    %c0_10 = arith.constant 0 : index
    %c0_11 = arith.constant 0 : index
    %14 = vector.load %arg5[%c0_10, %c0_11] : memref<8x32xf32, #tpu.memory_space<vmem>>, vector<8x32xf32>
    %15 = vector.extract_strided_slice %14 {offsets = [0, 0], sizes = [1, 32], strides = [1, 1]} : vector<8x32xf32> to vector<1x32xf32>
    %16 = vector.extract_strided_slice %14 {offsets = [1, 0], sizes = [1, 32], strides = [1, 1]} : vector<8x32xf32> to vector<1x32xf32>
    %17 = vector.extract_strided_slice %14 {offsets = [2, 0], sizes = [1, 32], strides = [1, 1]} : vector<8x32xf32> to vector<1x32xf32>
    %18 = vector.extract_strided_slice %14 {offsets = [3, 0], sizes = [1, 32], strides = [1, 1]} : vector<8x32xf32> to vector<1x32xf32>
    %19 = vector.extract_strided_slice %14 {offsets = [4, 0], sizes = [1, 32], strides = [1, 1]} : vector<8x32xf32> to vector<1x32xf32>
    %cst_12 = arith.constant dense<0.000000e+00> : vector<16x16xf32>
    %20 = tpu.matmul %10, %11, %cst_12 {dimension_numbers = #tpu.dot_dimension_numbers<[1], [1], [0], [0], [0, 0, 1, 0], [], []>} : vector<16x32xf32>, vector<16x32xf32>, vector<16x16xf32> -> vector<16x16xf32>
    %cst_13 = arith.constant dense<0.000000e+00> : vector<16x1xf32>
    %21 = tpu.matmul %10, %15, %cst_13 {dimension_numbers = #tpu.dot_dimension_numbers<[1], [1], [0], [0], [0, 0, 1, 0], [], []>} : vector<16x32xf32>, vector<1x32xf32>, vector<16x1xf32> -> vector<16x1xf32>
    %22 = vector.broadcast %21 : vector<16x1xf32> to vector<16x16xf32>
    %23 = arith.mulf %22, %1 : vector<16x16xf32>
    %24 = arith.addf %20, %23 : vector<16x16xf32>
    %cst_14 = arith.constant 0.176776692 : f32
    %25 = vector.broadcast %cst_14 : f32 to vector<16x16xf32>
    %26 = arith.mulf %24, %25 : vector<16x16xf32>
    %cst_15 = arith.constant -1.000000e+30 : f32
    %27 = vector.broadcast %cst_15 : f32 to vector<16x16xf32>
    %28 = arith.select %3, %26, %27 : vector<16x16xi1>, vector<16x16xf32>
    %cst_16 = arith.constant dense<0xFF800000> : vector<16xf32>
    %29 = vector.multi_reduction <maximumf>, %28, %cst_16 [1] : vector<16x16xf32> to vector<16xf32>
    %30 = vector.shape_cast %29 : vector<16xf32> to vector<16x1xf32>
    %31 = vector.broadcast %30 : vector<16x1xf32> to vector<16x16xf32>
    %32 = arith.subf %28, %31 : vector<16x16xf32>
    %33 = math.exp %32 : vector<16x16xf32>
    %cst_17 = arith.constant 0.000000e+00 : f32
    %34 = vector.broadcast %cst_17 : f32 to vector<16x16xf32>
    %35 = arith.select %3, %33, %34 : vector<16x16xi1>, vector<16x16xf32>
    %cst_18 = arith.constant dense<0.000000e+00> : vector<16xf32>
    %36 = vector.multi_reduction <add>, %35, %cst_18 [1] : vector<16x16xf32> to vector<16xf32>
    %37 = vector.shape_cast %36 : vector<16xf32> to vector<16x1xf32>
    %cst_19 = arith.constant 1.000000e-16 : f32
    %38 = vector.broadcast %cst_19 : f32 to vector<16x1xf32>
    %39 = arith.maximumf %37, %38 : vector<16x1xf32>
    %40 = tpu.reciprocal %39 {approx = true} : vector<16x1xf32> -> vector<16x1xf32>
    %41 = vector.broadcast %40 : vector<16x1xf32> to vector<16x16xf32>
    %42 = arith.mulf %35, %41 : vector<16x16xf32>
    %cst_20 = arith.constant dense<0.000000e+00> : vector<16x32xf32>
    %43 = tpu.matmul %42, %12, %cst_20 {dimension_numbers = #tpu.dot_dimension_numbers<[1], [0], [0], [1], [0, 0, 1, 1], [], []>} : vector<16x16xf32>, vector<16x32xf32>, vector<16x32xf32> -> vector<16x32xf32>
    %44 = arith.mulf %42, %1 : vector<16x16xf32>
    %cst_21 = arith.constant dense<0.000000e+00> : vector<16xf32>
    %45 = vector.multi_reduction <add>, %44, %cst_21 [1] : vector<16x16xf32> to vector<16xf32>
    %46 = vector.shape_cast %45 : vector<16xf32> to vector<16x1xf32>
    %47 = vector.broadcast %46 : vector<16x1xf32> to vector<16x32xf32>
    %48 = vector.broadcast %15 : vector<1x32xf32> to vector<16x32xf32>
    %49 = arith.mulf %47, %48 : vector<16x32xf32>
    %50 = arith.addf %43, %49 : vector<16x32xf32>
    %51 = vector.broadcast %18 : vector<1x32xf32> to vector<16x32xf32>
    %52 = arith.mulf %50, %51 : vector<16x32xf32>
    %53 = vector.broadcast %19 : vector<1x32xf32> to vector<16x32xf32>
    %54 = arith.mulf %13, %53 : vector<16x32xf32>
    %55 = arith.addf %52, %54 : vector<16x32xf32>
    %cst_22 = arith.constant dense<0.000000e+00> : vector<16xf32>
    %56 = vector.multi_reduction <add>, %55, %cst_22 [1] : vector<16x32xf32> to vector<16xf32>
    %57 = vector.shape_cast %56 : vector<16xf32> to vector<16x1xf32>
    %58 = arith.negf %57 : vector<16x1xf32>
    %59 = math.exp %58 : vector<16x1xf32>
    %cst_23 = arith.constant 1.000000e+00 : f32
    %60 = vector.broadcast %cst_23 : f32 to vector<16x1xf32>
    %61 = arith.addf %60, %59 : vector<16x1xf32>
    %62 = arith.divf %60, %61 : vector<16x1xf32>
    %63 = vector.broadcast %62 : vector<16x1xf32> to vector<16x32xf32>
    %64 = arith.mulf %63, %13 : vector<16x32xf32>
    %cst_24 = arith.constant 1.000000e+00 : f32
    %65 = vector.broadcast %cst_24 : f32 to vector<16x1xf32>
    %66 = arith.subf %65, %62 : vector<16x1xf32>
    %67 = vector.broadcast %66 : vector<16x1xf32> to vector<16x32xf32>
    %68 = arith.mulf %67, %50 : vector<16x32xf32>
    %69 = arith.addf %64, %68 : vector<16x32xf32>
    %cst_25 = arith.constant dense<0.000000e+00> : vector<16xf32>
    %70 = vector.multi_reduction <add>, %69, %cst_25 [1] : vector<16x32xf32> to vector<16xf32>
    %71 = vector.shape_cast %70 : vector<16xf32> to vector<16x1xf32>
    %cst_26 = arith.constant 3.200000e+01 : f32
    %72 = vector.broadcast %cst_26 : f32 to vector<16x1xf32>
    %73 = arith.divf %71, %72 : vector<16x1xf32>
    %74 = vector.broadcast %73 : vector<16x1xf32> to vector<16x32xf32>
    %75 = arith.subf %69, %74 : vector<16x32xf32>
    %76 = vector.broadcast %73 : vector<16x1xf32> to vector<16x32xf32>
    %77 = arith.subf %69, %76 : vector<16x32xf32>
    %78 = arith.mulf %75, %77 : vector<16x32xf32>
    %cst_27 = arith.constant dense<0.000000e+00> : vector<16xf32>
    %79 = vector.multi_reduction <add>, %78, %cst_27 [1] : vector<16x32xf32> to vector<16xf32>
    %80 = vector.shape_cast %79 : vector<16xf32> to vector<16x1xf32>
    %cst_28 = arith.constant 3.200000e+01 : f32
    %81 = vector.broadcast %cst_28 : f32 to vector<16x1xf32>
    %82 = arith.divf %80, %81 : vector<16x1xf32>
    %83 = vector.broadcast %73 : vector<16x1xf32> to vector<16x32xf32>
    %84 = arith.subf %69, %83 : vector<16x32xf32>
    %cst_29 = arith.constant 9.99999974E-6 : f32
    %85 = vector.broadcast %cst_29 : f32 to vector<16x1xf32>
    %86 = arith.addf %82, %85 : vector<16x1xf32>
    %87 = math.rsqrt %86 : vector<16x1xf32>
    %88 = vector.broadcast %87 : vector<16x1xf32> to vector<16x32xf32>
    %89 = arith.mulf %84, %88 : vector<16x32xf32>
    %90 = vector.broadcast %16 : vector<1x32xf32> to vector<16x32xf32>
    %91 = arith.mulf %89, %90 : vector<16x32xf32>
    %92 = vector.broadcast %17 : vector<1x32xf32> to vector<16x32xf32>
    %93 = arith.addf %91, %92 : vector<16x32xf32>
    %cst_30 = arith.constant 0.000000e+00 : f32
    %94 = vector.broadcast %cst_30 : f32 to vector<16x32xf32>
    %95 = arith.maximumf %93, %94 : vector<16x32xf32>
    %c0_31 = arith.constant 0 : index
    %c0_32 = arith.constant 0 : index
    %96 = vector.load %arg6[%c0_31, %c0_32] : memref<32x128xf32, #tpu.memory_space<vmem>>, vector<32x128xf32>
    %cst_33 = arith.constant dense<0.000000e+00> : vector<16x128xf32>
    %97 = tpu.matmul %95, %96, %cst_33 {dimension_numbers = #tpu.dot_dimension_numbers<[1], [0], [0], [1], [0, 0, 1, 1], [], []>} : vector<16x32xf32>, vector<32x128xf32>, vector<16x128xf32> -> vector<16x128xf32>
    %c0_34 = arith.constant 0 : index
    %c0_35 = arith.constant 0 : index
    %98 = vector.load %arg7[%c0_34, %c0_35] : memref<1x128xf32, #tpu.memory_space<vmem>>, vector<1x128xf32>
    %99 = vector.broadcast %98 : vector<1x128xf32> to vector<16x128xf32>
    %100 = arith.addf %97, %99 : vector<16x128xf32>
    %101 = vector.extract_strided_slice %100 {offsets = [0, 0], sizes = [16, 32], strides = [1, 1]} : vector<16x128xf32> to vector<16x32xf32>
    %102 = vector.extract_strided_slice %100 {offsets = [0, 32], sizes = [16, 32], strides = [1, 1]} : vector<16x128xf32> to vector<16x32xf32>
    %103 = vector.extract_strided_slice %100 {offsets = [0, 64], sizes = [16, 32], strides = [1, 1]} : vector<16x128xf32> to vector<16x32xf32>
    %104 = vector.extract_strided_slice %100 {offsets = [0, 96], sizes = [16, 32], strides = [1, 1]} : vector<16x128xf32> to vector<16x32xf32>
    %c0_36 = arith.constant 0 : index
    %c0_37 = arith.constant 0 : index
    %105 = vector.load %arg8[%c0_36, %c0_37] : memref<8x32xf32, #tpu.memory_space<vmem>>, vector<8x32xf32>
    %106 = vector.extract_strided_slice %105 {offsets = [0, 0], sizes = [1, 32], strides = [1, 1]} : vector<8x32xf32> to vector<1x32xf32>
    %107 = vector.extract_strided_slice %105 {offsets = [1, 0], sizes = [1, 32], strides = [1, 1]} : vector<8x32xf32> to vector<1x32xf32>
    %108 = vector.extract_strided_slice %105 {offsets = [2, 0], sizes = [1, 32], strides = [1, 1]} : vector<8x32xf32> to vector<1x32xf32>
    %109 = vector.extract_strided_slice %105 {offsets = [3, 0], sizes = [1, 32], strides = [1, 1]} : vector<8x32xf32> to vector<1x32xf32>
    %110 = vector.extract_strided_slice %105 {offsets = [4, 0], sizes = [1, 32], strides = [1, 1]} : vector<8x32xf32> to vector<1x32xf32>
    %cst_38 = arith.constant dense<0.000000e+00> : vector<16x16xf32>
    %111 = tpu.matmul %101, %102, %cst_38 {dimension_numbers = #tpu.dot_dimension_numbers<[1], [1], [0], [0], [0, 0, 1, 0], [], []>} : vector<16x32xf32>, vector<16x32xf32>, vector<16x16xf32> -> vector<16x16xf32>
    %cst_39 = arith.constant dense<0.000000e+00> : vector<16x1xf32>
    %112 = tpu.matmul %101, %106, %cst_39 {dimension_numbers = #tpu.dot_dimension_numbers<[1], [1], [0], [0], [0, 0, 1, 0], [], []>} : vector<16x32xf32>, vector<1x32xf32>, vector<16x1xf32> -> vector<16x1xf32>
    %113 = vector.broadcast %112 : vector<16x1xf32> to vector<16x16xf32>
    %114 = arith.mulf %113, %1 : vector<16x16xf32>
    %115 = arith.addf %111, %114 : vector<16x16xf32>
    %cst_40 = arith.constant 0.176776692 : f32
    %116 = vector.broadcast %cst_40 : f32 to vector<16x16xf32>
    %117 = arith.mulf %115, %116 : vector<16x16xf32>
    %cst_41 = arith.constant -1.000000e+30 : f32
    %118 = vector.broadcast %cst_41 : f32 to vector<16x16xf32>
    %119 = arith.select %3, %117, %118 : vector<16x16xi1>, vector<16x16xf32>
    %cst_42 = arith.constant dense<0xFF800000> : vector<16xf32>
    %120 = vector.multi_reduction <maximumf>, %119, %cst_42 [1] : vector<16x16xf32> to vector<16xf32>
    %121 = vector.shape_cast %120 : vector<16xf32> to vector<16x1xf32>
    %122 = vector.broadcast %121 : vector<16x1xf32> to vector<16x16xf32>
    %123 = arith.subf %119, %122 : vector<16x16xf32>
    %124 = math.exp %123 : vector<16x16xf32>
    %cst_43 = arith.constant 0.000000e+00 : f32
    %125 = vector.broadcast %cst_43 : f32 to vector<16x16xf32>
    %126 = arith.select %3, %124, %125 : vector<16x16xi1>, vector<16x16xf32>
    %cst_44 = arith.constant dense<0.000000e+00> : vector<16xf32>
    %127 = vector.multi_reduction <add>, %126, %cst_44 [1] : vector<16x16xf32> to vector<16xf32>
    %128 = vector.shape_cast %127 : vector<16xf32> to vector<16x1xf32>
    %cst_45 = arith.constant 1.000000e-16 : f32
    %129 = vector.broadcast %cst_45 : f32 to vector<16x1xf32>
    %130 = arith.maximumf %128, %129 : vector<16x1xf32>
    %131 = tpu.reciprocal %130 {approx = true} : vector<16x1xf32> -> vector<16x1xf32>
    %132 = vector.broadcast %131 : vector<16x1xf32> to vector<16x16xf32>
    %133 = arith.mulf %126, %132 : vector<16x16xf32>
    %cst_46 = arith.constant dense<0.000000e+00> : vector<16x32xf32>
    %134 = tpu.matmul %133, %103, %cst_46 {dimension_numbers = #tpu.dot_dimension_numbers<[1], [0], [0], [1], [0, 0, 1, 1], [], []>} : vector<16x16xf32>, vector<16x32xf32>, vector<16x32xf32> -> vector<16x32xf32>
    %135 = arith.mulf %133, %1 : vector<16x16xf32>
    %cst_47 = arith.constant dense<0.000000e+00> : vector<16xf32>
    %136 = vector.multi_reduction <add>, %135, %cst_47 [1] : vector<16x16xf32> to vector<16xf32>
    %137 = vector.shape_cast %136 : vector<16xf32> to vector<16x1xf32>
    %138 = vector.broadcast %137 : vector<16x1xf32> to vector<16x32xf32>
    %139 = vector.broadcast %106 : vector<1x32xf32> to vector<16x32xf32>
    %140 = arith.mulf %138, %139 : vector<16x32xf32>
    %141 = arith.addf %134, %140 : vector<16x32xf32>
    %142 = vector.broadcast %109 : vector<1x32xf32> to vector<16x32xf32>
    %143 = arith.mulf %141, %142 : vector<16x32xf32>
    %144 = vector.broadcast %110 : vector<1x32xf32> to vector<16x32xf32>
    %145 = arith.mulf %104, %144 : vector<16x32xf32>
    %146 = arith.addf %143, %145 : vector<16x32xf32>
    %cst_48 = arith.constant dense<0.000000e+00> : vector<16xf32>
    %147 = vector.multi_reduction <add>, %146, %cst_48 [1] : vector<16x32xf32> to vector<16xf32>
    %148 = vector.shape_cast %147 : vector<16xf32> to vector<16x1xf32>
    %149 = arith.negf %148 : vector<16x1xf32>
    %150 = math.exp %149 : vector<16x1xf32>
    %cst_49 = arith.constant 1.000000e+00 : f32
    %151 = vector.broadcast %cst_49 : f32 to vector<16x1xf32>
    %152 = arith.addf %151, %150 : vector<16x1xf32>
    %153 = arith.divf %151, %152 : vector<16x1xf32>
    %154 = vector.broadcast %153 : vector<16x1xf32> to vector<16x32xf32>
    %155 = arith.mulf %154, %104 : vector<16x32xf32>
    %cst_50 = arith.constant 1.000000e+00 : f32
    %156 = vector.broadcast %cst_50 : f32 to vector<16x1xf32>
    %157 = arith.subf %156, %153 : vector<16x1xf32>
    %158 = vector.broadcast %157 : vector<16x1xf32> to vector<16x32xf32>
    %159 = arith.mulf %158, %141 : vector<16x32xf32>
    %160 = arith.addf %155, %159 : vector<16x32xf32>
    %cst_51 = arith.constant dense<0.000000e+00> : vector<16xf32>
    %161 = vector.multi_reduction <add>, %160, %cst_51 [1] : vector<16x32xf32> to vector<16xf32>
    %162 = vector.shape_cast %161 : vector<16xf32> to vector<16x1xf32>
    %cst_52 = arith.constant 3.200000e+01 : f32
    %163 = vector.broadcast %cst_52 : f32 to vector<16x1xf32>
    %164 = arith.divf %162, %163 : vector<16x1xf32>
    %165 = vector.broadcast %164 : vector<16x1xf32> to vector<16x32xf32>
    %166 = arith.subf %160, %165 : vector<16x32xf32>
    %167 = vector.broadcast %164 : vector<16x1xf32> to vector<16x32xf32>
    %168 = arith.subf %160, %167 : vector<16x32xf32>
    %169 = arith.mulf %166, %168 : vector<16x32xf32>
    %cst_53 = arith.constant dense<0.000000e+00> : vector<16xf32>
    %170 = vector.multi_reduction <add>, %169, %cst_53 [1] : vector<16x32xf32> to vector<16xf32>
    %171 = vector.shape_cast %170 : vector<16xf32> to vector<16x1xf32>
    %cst_54 = arith.constant 3.200000e+01 : f32
    %172 = vector.broadcast %cst_54 : f32 to vector<16x1xf32>
    %173 = arith.divf %171, %172 : vector<16x1xf32>
    %174 = vector.broadcast %164 : vector<16x1xf32> to vector<16x32xf32>
    %175 = arith.subf %160, %174 : vector<16x32xf32>
    %cst_55 = arith.constant 9.99999974E-6 : f32
    %176 = vector.broadcast %cst_55 : f32 to vector<16x1xf32>
    %177 = arith.addf %173, %176 : vector<16x1xf32>
    %178 = math.rsqrt %177 : vector<16x1xf32>
    %179 = vector.broadcast %178 : vector<16x1xf32> to vector<16x32xf32>
    %180 = arith.mulf %175, %179 : vector<16x32xf32>
    %181 = vector.broadcast %107 : vector<1x32xf32> to vector<16x32xf32>
    %182 = arith.mulf %180, %181 : vector<16x32xf32>
    %183 = vector.broadcast %108 : vector<1x32xf32> to vector<16x32xf32>
    %184 = arith.addf %182, %183 : vector<16x32xf32>
    %cst_56 = arith.constant 0.000000e+00 : f32
    %185 = vector.broadcast %cst_56 : f32 to vector<16x32xf32>
    %186 = arith.maximumf %184, %185 : vector<16x32xf32>
    %c0_57 = arith.constant 0 : index
    %c0_58 = arith.constant 0 : index
    %187 = vector.load %arg9[%c0_57, %c0_58] : memref<32x64xf32, #tpu.memory_space<vmem>>, vector<32x64xf32>
    %cst_59 = arith.constant dense<0.000000e+00> : vector<16x64xf32>
    %188 = tpu.matmul %186, %187, %cst_59 {dimension_numbers = #tpu.dot_dimension_numbers<[1], [0], [0], [1], [0, 0, 1, 1], [], []>} : vector<16x32xf32>, vector<32x64xf32>, vector<16x64xf32> -> vector<16x64xf32>
    %c0_60 = arith.constant 0 : index
    %c0_61 = arith.constant 0 : index
    %189 = vector.load %arg10[%c0_60, %c0_61] : memref<1x64xf32, #tpu.memory_space<vmem>>, vector<1x64xf32>
    %190 = vector.broadcast %189 : vector<1x64xf32> to vector<16x64xf32>
    %191 = arith.addf %188, %190 : vector<16x64xf32>
    %192 = vector.extract_strided_slice %191 {offsets = [0, 0], sizes = [16, 16], strides = [1, 1]} : vector<16x64xf32> to vector<16x16xf32>
    %193 = vector.extract_strided_slice %191 {offsets = [0, 16], sizes = [16, 16], strides = [1, 1]} : vector<16x64xf32> to vector<16x16xf32>
    %194 = vector.extract_strided_slice %191 {offsets = [0, 32], sizes = [16, 16], strides = [1, 1]} : vector<16x64xf32> to vector<16x16xf32>
    %195 = vector.extract_strided_slice %191 {offsets = [0, 48], sizes = [16, 16], strides = [1, 1]} : vector<16x64xf32> to vector<16x16xf32>
    %c0_62 = arith.constant 0 : index
    %c0_63 = arith.constant 0 : index
    %196 = vector.load %arg11[%c0_62, %c0_63] : memref<8x16xf32, #tpu.memory_space<vmem>>, vector<8x16xf32>
    %197 = vector.extract_strided_slice %196 {offsets = [0, 0], sizes = [1, 16], strides = [1, 1]} : vector<8x16xf32> to vector<1x16xf32>
    %198 = vector.extract_strided_slice %196 {offsets = [3, 0], sizes = [1, 16], strides = [1, 1]} : vector<8x16xf32> to vector<1x16xf32>
    %199 = vector.extract_strided_slice %196 {offsets = [4, 0], sizes = [1, 16], strides = [1, 1]} : vector<8x16xf32> to vector<1x16xf32>
    %cst_64 = arith.constant dense<0.000000e+00> : vector<16x16xf32>
    %200 = tpu.matmul %192, %193, %cst_64 {dimension_numbers = #tpu.dot_dimension_numbers<[1], [1], [0], [0], [0, 0, 1, 0], [], []>} : vector<16x16xf32>, vector<16x16xf32>, vector<16x16xf32> -> vector<16x16xf32>
    %cst_65 = arith.constant dense<0.000000e+00> : vector<16x1xf32>
    %201 = tpu.matmul %192, %197, %cst_65 {dimension_numbers = #tpu.dot_dimension_numbers<[1], [1], [0], [0], [0, 0, 1, 0], [], []>} : vector<16x16xf32>, vector<1x16xf32>, vector<16x1xf32> -> vector<16x1xf32>
    %202 = vector.broadcast %201 : vector<16x1xf32> to vector<16x16xf32>
    %203 = arith.mulf %202, %1 : vector<16x16xf32>
    %204 = arith.addf %200, %203 : vector<16x16xf32>
    %cst_66 = arith.constant 2.500000e-01 : f32
    %205 = vector.broadcast %cst_66 : f32 to vector<16x16xf32>
    %206 = arith.mulf %204, %205 : vector<16x16xf32>
    %cst_67 = arith.constant -1.000000e+30 : f32
    %207 = vector.broadcast %cst_67 : f32 to vector<16x16xf32>
    %208 = arith.select %3, %206, %207 : vector<16x16xi1>, vector<16x16xf32>
    %cst_68 = arith.constant dense<0xFF800000> : vector<16xf32>
    %209 = vector.multi_reduction <maximumf>, %208, %cst_68 [1] : vector<16x16xf32> to vector<16xf32>
    %210 = vector.shape_cast %209 : vector<16xf32> to vector<16x1xf32>
    %211 = vector.broadcast %210 : vector<16x1xf32> to vector<16x16xf32>
    %212 = arith.subf %208, %211 : vector<16x16xf32>
    %213 = math.exp %212 : vector<16x16xf32>
    %cst_69 = arith.constant 0.000000e+00 : f32
    %214 = vector.broadcast %cst_69 : f32 to vector<16x16xf32>
    %215 = arith.select %3, %213, %214 : vector<16x16xi1>, vector<16x16xf32>
    %cst_70 = arith.constant dense<0.000000e+00> : vector<16xf32>
    %216 = vector.multi_reduction <add>, %215, %cst_70 [1] : vector<16x16xf32> to vector<16xf32>
    %217 = vector.shape_cast %216 : vector<16xf32> to vector<16x1xf32>
    %cst_71 = arith.constant 1.000000e-16 : f32
    %218 = vector.broadcast %cst_71 : f32 to vector<16x1xf32>
    %219 = arith.maximumf %217, %218 : vector<16x1xf32>
    %220 = tpu.reciprocal %219 {approx = true} : vector<16x1xf32> -> vector<16x1xf32>
    %221 = vector.broadcast %220 : vector<16x1xf32> to vector<16x16xf32>
    %222 = arith.mulf %215, %221 : vector<16x16xf32>
    %cst_72 = arith.constant dense<0.000000e+00> : vector<16x16xf32>
    %223 = tpu.matmul %222, %194, %cst_72 {dimension_numbers = #tpu.dot_dimension_numbers<[1], [0], [0], [1], [0, 0, 1, 1], [], []>} : vector<16x16xf32>, vector<16x16xf32>, vector<16x16xf32> -> vector<16x16xf32>
    %224 = arith.mulf %222, %1 : vector<16x16xf32>
    %cst_73 = arith.constant dense<0.000000e+00> : vector<16xf32>
    %225 = vector.multi_reduction <add>, %224, %cst_73 [1] : vector<16x16xf32> to vector<16xf32>
    %226 = vector.shape_cast %225 : vector<16xf32> to vector<16x1xf32>
    %227 = vector.broadcast %226 : vector<16x1xf32> to vector<16x16xf32>
    %228 = vector.broadcast %197 : vector<1x16xf32> to vector<16x16xf32>
    %229 = arith.mulf %227, %228 : vector<16x16xf32>
    %230 = arith.addf %223, %229 : vector<16x16xf32>
    %231 = vector.broadcast %198 : vector<1x16xf32> to vector<16x16xf32>
    %232 = arith.mulf %230, %231 : vector<16x16xf32>
    %233 = vector.broadcast %199 : vector<1x16xf32> to vector<16x16xf32>
    %234 = arith.mulf %195, %233 : vector<16x16xf32>
    %235 = arith.addf %232, %234 : vector<16x16xf32>
    %cst_74 = arith.constant dense<0.000000e+00> : vector<16xf32>
    %236 = vector.multi_reduction <add>, %235, %cst_74 [1] : vector<16x16xf32> to vector<16xf32>
    %237 = vector.shape_cast %236 : vector<16xf32> to vector<16x1xf32>
    %238 = arith.negf %237 : vector<16x1xf32>
    %239 = math.exp %238 : vector<16x1xf32>
    %cst_75 = arith.constant 1.000000e+00 : f32
    %240 = vector.broadcast %cst_75 : f32 to vector<16x1xf32>
    %241 = arith.addf %240, %239 : vector<16x1xf32>
    %242 = arith.divf %240, %241 : vector<16x1xf32>
    %243 = vector.broadcast %242 : vector<16x1xf32> to vector<16x16xf32>
    %244 = arith.mulf %243, %195 : vector<16x16xf32>
    %cst_76 = arith.constant 1.000000e+00 : f32
    %245 = vector.broadcast %cst_76 : f32 to vector<16x1xf32>
    %246 = arith.subf %245, %242 : vector<16x1xf32>
    %247 = vector.broadcast %246 : vector<16x1xf32> to vector<16x16xf32>
    %248 = arith.mulf %247, %230 : vector<16x16xf32>
    %249 = arith.addf %244, %248 : vector<16x16xf32>
    %c0_77 = arith.constant 0 : index
    %c0_78 = arith.constant 0 : index
    %250 = vector.load %arg12[%c0_77, %c0_78] : memref<16x16xf32, #tpu.memory_space<vmem>>, vector<16x16xf32>
    tpu.vector_store %arg12[%c0_77, %c0_78], %249 {strides = array<i32>} : memref<16x16xf32, #tpu.memory_space<vmem>>, vector<16x16xf32>,
    return
  }
}

</mosaic_0001>

<bundles_post_ra>
// kernel: tpu_custom_call.1
= control target key start
LH: loop header
LB: loop body
LE: loop exit
PB: predicated region body
PF: predicated region fallthrough
CT: control target
= control target key end

     0   :  { %17 = vsyncpa [#allocation3], 0  ;;  %s2289_s0 = inlined_call_operand.vmem [shape: f32[16,8], index: 0, kind: input, shape index: {}]   ;;  %s2290_s1 = inlined_call_operand.hbm [shape: f32[16,16], index: 1, kind: input, shape index: {}]   ;;  %s2291_s2 = inlined_call_operand.hbm [shape: f32[16,16], index: 2, kind: input, shape index: {}]   ;;  %s2292_s3 = inlined_call_operand.hbm [shape: f32[8,128], index: 3, kind: input, shape index: {}]   ;;  %s2293_s4 = inlined_call_operand.hbm [shape: f32[1,128], index: 4, kind: input, shape index: {}]   ;;  %s2294_s5 = inlined_call_operand.hbm [shape: f32[8,32], index: 5, kind: input, shape index: {}]   ;;  %s2295_s6 = inlined_call_operand.vmem [shape: f32[32,128], index: 6, kind: input, shape index: {}]   ;;  %s2296_s7 = inlined_call_operand.hbm [shape: f32[1,128], index: 7, kind: input, shape index: {}]   ;;  %s2297_s8 = inlined_call_operand.hbm [shape: f32[8,32], index: 8, kind: input, shape index: {}]   ;;  %s2298_s9 = inlined_call_operand.hbm [shape: f32[32,64], index: 9, kind: input, shape index: {}]   ;;  %s2299_s10 = inlined_call_operand.vmem [shape: f32[1,64], index: 10, kind: input, shape index: {}]   ;;  %s2300_s11 = inlined_call_operand.vmem [shape: f32[8,16], index: 11, kind: input, shape index: {}]   ;;  %s2301_s12 = inlined_call_operand.hbm [shape: f32[16,16], index: 12, kind: output, shape index: {}]  }
   0x1   :  { %18 = vsyncpa [#allocation6], 0 }
   0x2   :  { %19 = vsyncpa [#allocation9], 0 }
   0x3   :  { %20 = vsyncpa [#allocation12], 0 }
   0x4   :  { %21 = vsyncpa [#allocation15], 0 }
   0x5   :  { %22 = vsyncpa [#allocation4], 0  ;;  %s1872_s21 = smov [#allocation5]   ;;  %s1873_s23 = smov [#allocation8]  }
   0x6   :  { %s42_s22 = sshll.u32 %s1872_s21, 4  ;;  %s65_s24 = sshll.u32 %s1873_s23, 4  ;;  %s43_s22 = int_to_ptr.vmem [resolvable:$true] %s42_s22  ;;  %s66_s24 = int_to_ptr.vmem [resolvable:$true] %s65_s24 }
   0x7   :  { %s1688_s25 = scalar_lea.vmem %s43_s22, 256  ;;  %p1693_p1 = scmp.lt.s32.totalorder %s43_s22, %s43_s22 }
   0x8   :  { %p1689_p0 = scmp.ne.s32.totalorder %s43_s22, %s1688_s25  ;;  %p1694_p2 = scmp.lt.s32.totalorder %s1688_s25, %s1688_s25 }
   0xa   :  { %p1695_p3 = por %p1694_p2, %p1693_p1 }
   0xc   :  { %p1696_p4 = pnand %p1695_p3, %p1689_p0 }
   0xe   :  { %1699 = shalt.err (!%p1696_p4)
}
   0xf   :  { %s1874_s26 = smov 128   ;;  %s1875_s27 = smov 8  }
  0x10   :  { %48 = dma.hbm_to_vmem [thread:$0]  %s2291_s2, 256, %s43_s22, [#allocation6], %s1874_s26, %s1874_s26, %s1875_s27  }
  0x11   :  { %s1708_s30 = scalar_lea.vmem %s66_s24, 16  ;;  %s1712_s13 = scalar_lea.vmem %s66_s24, 32 }
  0x12   :  { %p1709_p5 = scmp.ne.s32.totalorder %s66_s24, %s1708_s30  ;;  %p1713_p6 = scmp.lt.s32.totalorder %s66_s24, %s66_s24 }
  0x13   :  { %p1714_p7 = scmp.lt.s32.totalorder %s1712_s13, %s1708_s30 }
  0x15   :  { %p1715_p8 = por %p1714_p7, %p1713_p6 }
  0x17   :  { %p1716_p9 = pnand %p1715_p8, %p1709_p5 }
  0x19   :  { %1719 = shalt.err (!%p1716_p9)
}
  0x1a   :  { %68 = dma.hbm_to_vmem [thread:$0]  %s2293_s4, 16, %s66_s24, [#allocation9]  }
  0x1b   :  { %s1876_s16 = smov [#allocation11]   ;;  %s1877_s18 = smov [#allocation2]  }
  0x1c   :  { %s87_s17 = sshll.u32 %s1876_s16, 4  ;;  %s30_s19 = sshll.u32 %s1877_s18, 4  ;;  %s88_s17 = int_to_ptr.vmem [resolvable:$true] %s87_s17  ;;  %s31_s19 = int_to_ptr.vmem [resolvable:$true] %s30_s19 }
  0x1d   :  { %s1728_s20 = scalar_lea.vmem %s88_s17, 16  ;;  %s1732_s2 = scalar_lea.vmem %s88_s17, 32 }
  0x1e   :  { %p1729_p10 = scmp.ne.s32.totalorder %s88_s17, %s1728_s20  ;;  %p1733_p11 = scmp.lt.s32.totalorder %s88_s17, %s88_s17 }
  0x1f   :  { %p1734_p12 = scmp.lt.s32.totalorder %s1732_s2, %s1728_s20 }
  0x21   :  { %p1735_p13 = por %p1734_p12, %p1733_p11 }
  0x23   :  { %p1736_p0 = pnand %p1735_p13, %p1729_p10 }
  0x25   :  { %1739 = shalt.err (!%p1736_p0)
}
  0x26   :  { %90 = dma.hbm_to_vmem [thread:$0]  %s2296_s7, 16, %s88_s17, [#allocation12]  }
  0x27   :  { %s1748_s23 = scalar_lea.vmem %s31_s19, 256  ;;  %p1753_p2 = scmp.lt.s32.totalorder %s31_s19, %s31_s19 }
  0x28   :  { %p1749_p1 = scmp.ne.s32.totalorder %s31_s19, %s1748_s23  ;;  %p1754_p3 = scmp.lt.s32.totalorder %s1748_s23, %s1748_s23 }
  0x2a   :  { %p1755_p4 = por %p1754_p3, %p1753_p2 }
  0x2c   :  { %p1756_p5 = pnand %p1755_p4, %p1749_p1 }
  0x2e   :  { %1759 = shalt.err (!%p1756_p5)
}
  0x2f   :  { %36 = dma.hbm_to_vmem [thread:$0]  %s2290_s1, 256, %s31_s19, [#allocation3], %s1874_s26, %s1874_s26, %s1875_s27  }
  0x30   :  { %s1878_s25 = smov [#allocation7]   ;;  %s1879_s29 = smov [#allocation10]  }
  0x31   :  { %s55_s28 = sshll.u32 %s1878_s25, 4  ;;  %s75_s30 = sshll.u32 %s1879_s29, 4  ;;  %s56_s28 = int_to_ptr.vmem [resolvable:$true] %s55_s28  ;;  %s76_s30 = int_to_ptr.vmem [resolvable:$true] %s75_s30 }
  0x32   :  { %s1768_s7 = scalar_lea.vmem %s56_s28, 128  ;;  %p1773_p7 = scmp.lt.s32.totalorder %s56_s28, %s56_s28 }
  0x33   :  { %p1769_p6 = scmp.ne.s32.totalorder %s56_s28, %s1768_s7  ;;  %p1774_p8 = scmp.lt.s32.totalorder %s1768_s7, %s1768_s7 }
  0x35   :  { %p1775_p9 = por %p1774_p8, %p1773_p7 }
  0x37   :  { %p1776_p10 = pnand %p1775_p9, %p1769_p6 }
  0x39   :  { %1779 = shalt.err (!%p1776_p10)
}
  0x3a   :  { %58 = dma.hbm_to_vmem [thread:$0]  %s2292_s3, 128, %s56_s28, [#allocation6]  }
  0x3b   :  { %s1788_s15 = scalar_lea.vmem %s76_s30, 128  ;;  %p1793_p12 = scmp.lt.s32.totalorder %s76_s30, %s76_s30 }
  0x3c   :  { %p1789_p11 = scmp.ne.s32.totalorder %s76_s30, %s1788_s15  ;;  %p1794_p13 = scmp.lt.s32.totalorder %s1788_s15, %s1788_s15 }
  0x3e   :  { %p1795_p0 = por %p1794_p13, %p1793_p12 }
  0x40   :  { %p1796_p1 = pnand %p1795_p0, %p1789_p11 }
  0x42   :  { %1799 = shalt.err (!%p1796_p1)
}
  0x43   :  { %78 = dma.hbm_to_vmem [thread:$0]  %s2294_s5, 128, %s76_s30, [#allocation9]  }
  0x44   :  { %s1880_s17 = smov [#allocation13]   ;;  %s1881_s19 = smov [#allocation14]  }
  0x45   :  { %s97_s18 = sshll.u32 %s1880_s17, 4  ;;  %s106_s20 = sshll.u32 %s1881_s19, 4  ;;  %s98_s18 = int_to_ptr.vmem [resolvable:$true] %s97_s18  ;;  %s107_s20 = int_to_ptr.vmem [resolvable:$true] %s106_s20 }
  0x46   :  { %s1808_s2 = scalar_lea.vmem %s98_s18, 128  ;;  %p1813_p3 = scmp.lt.s32.totalorder %s98_s18, %s98_s18 }
  0x47   :  { %p1809_p2 = scmp.ne.s32.totalorder %s98_s18, %s1808_s2  ;;  %p1814_p4 = scmp.lt.s32.totalorder %s1808_s2, %s1808_s2 }
  0x49   :  { %p1815_p5 = por %p1814_p4, %p1813_p3 }
  0x4b   :  { %p1816_p6 = pnand %p1815_p5, %p1809_p2 }
  0x4d   :  { %1819 = shalt.err (!%p1816_p6)
}
  0x4e   :  { %100 = dma.hbm_to_vmem [thread:$0]  %s2297_s8, 128, %s98_s18, [#allocation12]  }
  0x4f   :  { %s1828_s22 = scalar_lea.vmem %s107_s20, 512  ;;  %p1833_p8 = scmp.lt.s32.totalorder %s107_s20, %s107_s20 }
  0x50   :  { %p1829_p7 = scmp.ne.s32.totalorder %s107_s20, %s1828_s22  ;;  %p1834_p9 = scmp.lt.s32.totalorder %s1828_s22, %s1828_s22 }
  0x52   :  { %p1835_p10 = por %p1834_p9, %p1833_p8 }
  0x54   :  { %p1836_p11 = pnand %p1835_p10, %p1829_p7 }
  0x56   :  { %1839 = shalt.err (!%p1836_p11)
}
  0x57   :  { %112 = dma.hbm_to_vmem [thread:$0]  %s2298_s9, 512, %s107_s20, [#allocation15], %s1874_s26, %s1874_s26, %s1875_s27  }
  0x58   :  { %1860 = dma.done.wait [#allocation3], 256  }
  0x59   :  { %1861 = vsyncadd [#allocation3], 4294967040 }
  0x5a   :  { %1862 = dma.done.wait [#allocation6], 384  }
  0x5b   :  { %1863 = vsyncadd [#allocation6], 4294966912 }
  0x5c   :  { %1864 = dma.done.wait [#allocation9], 144  }
  0x5d   :  { %1865 = vsyncadd [#allocation9], 4294967152 }
  0x5e   :  { %1866 = dma.done.wait [#allocation12], 144  }
  0x5f   :  { %1867 = vsyncadd [#allocation12], 4294967152 }
  0x60   :  { %1868 = dma.done.wait [#allocation15], 512  }
  0x61   :  { %1869 = vsyncadd [#allocation15], 4294966784  ;;  %vm157_vm0 = vcmask 64512   ;;  %v149_v0 = vld [vmem:[#allocation7] sm:$0xff]  ;;  %v148_v2 = vld [vmem:[%s2289_s0 + $0x8] sm:$0xff]  ;;  %v240_v3 = vlaneseq  ;;  %vm246_vm1 = vcmask 261120  }
  0x62   :  { %v147_v1 = vld [vmem:[%s2289_s0] sm:$0xff]  ;;  %1538 = vmatprep.subr.mxu0 %v149_v0  ;;  %v1466_v5 = vld [vmem:[#allocation8] ss:$0 sm:$0xff]  ;;  %v1998_v8 = vld [vmem:[#allocation10] sm:$0xff]  ;;  %s1882_s0 = smov 96   ;;  %vm348_vm3 = vcmask 130048  }
  0x63   :  { %1540 = vmatprep.mubr.msk.f32.mxu0 %vm157_vm0, %v147_v1  ;;  %1539 = vmatpush3.msra.mxu0 %v149_v0  ;;  %v1993_v4 = vshrl.u32 %v240_v3, 7  ;;  %v2026_v21 = vld [vmem:[#allocation5 + $0x8] sm:$0xff]  ;;  %v2028_v22 = vld [vmem:[#allocation5] sm:$0xff]  ;;  %v2031_v24 = vld [vmem:[#allocation2 + $0x8] sm:$0xff]  ;;  %s1883_s9 = smov 64   ;;  %s1884_s28 = smov 32  }
  0x64   :  { %1541 = vmatmul.mubr.msk.f32.vlgmr.msra.gmra.mxu0 %vm157_vm0, %v148_v2  ;;  %v2034_v28 = vld [vmem:[#allocation2] sm:$0xff]  ;;  %vm146_vm2 = vcmp.gt.f32.partialorder %v2031_v24, 0.0  ;;  %s1885_s18 = smov 112   ;;  %s1888_s2 = smov [#allocation16]  }
  0x65   :  { %v1996_v6 = vsub.s32 0, %v1993_v4  ;;  %vm145_vm4 = vcmp.gt.f32.partialorder %v2034_v28, 0.0  ;;  %v2045_v37 = vsub.s32 4, %v1993_v4  ;;  %s1450_s3 = sshll.u32 %s1888_s2, 4  ;;  %s1451_s3 = int_to_ptr.vmem [resolvable:$true] %s1450_s3 }
  0x66   :  { %s1840_s21 = scalar_lea.vmem %s1451_s3, 256  ;;  %p1845_p13 = scmp.lt.s32.totalorder %s1451_s3, %s1451_s3 }
  0x67   :  { %v2008_v12 = vrot.slane %v1998_v8, %v1996_v6  ;;  %v481_v38 = vrot.slane %v1998_v8, %v2045_v37  ;;  %p1841_p12 = scmp.ne.s32.totalorder %s1451_s3, %s1840_s21  ;;  %p1846_p0 = scmp.lt.s32.totalorder %s1840_s21, %s1840_s21 }
  0x69   :  { %p1847_p1 = por %p1846_p0, %p1845_p13 }
  0x6b   :  { %p1848_p2 = pnand %p1847_p1, %p1841_p12 }
 0x124   :  { %v1542_v7 = vpop.f32.mrf.mxu0 }
 0x125   :  { %v2000_v9 = vadd.f32 %v1542_v7, %v1466_v5 }
 0x126   :  { %v230_v10 = vpop.f32.mrf.mxu0 }
 0x127   :  { %v2002_v11 = vadd.f32 %v1466_v5, %v230_v10  ;;  %259 = vrot.lane.b32.xlu0 %v2000_v9, %s1882_s0  ;;  %v245_v15 = vmul.f32 %v2008_v12, %v2000_v9  ;;  %v2071_v5 = vsub.s32 3, %v1993_v4 }
 0x129   :  { %1547 = vmatprep.mubr.msk.f32.mxu1 %vm246_vm1, %v2002_v11  ;;  %v244_v13 = vmul.f32 %v2008_v12, %v2002_v11  ;;  %v250_v16 = vsel %vm246_vm1, %v245_v15, 0.0 }
 0x12b   :  { %257 = vrot.lane.b32.xlu0 %v2002_v11, %s1882_s0  ;;  %v247_v14 = vsel %vm246_vm1, %v244_v13, 0.0 }
 0x12c   :  { %248 = vadd.xlane.f32.xlu1 %v247_v14  ;;  %v475_v14 = vrot.slane %v1998_v8, %v2071_v5 }
 0x130   :  { %251 = vadd.xlane.f32.xlu1 %v250_v16 }
 0x199   :  { %v260_v17 = vpop.permute.xlu0 %259 }
 0x19a   :  { %1543 = vmatprep.subr.msk.mxu1 %vm246_vm1, %v260_v17 }
 0x19b   :  { %1544 = vmatpush3.xpose.msk.msra.mxu1 %vm246_vm1, %v260_v17 }
 0x19d   :  { %v258_v18 = vpop.permute.xlu0 %257 }
 0x19e   :  { %1545 = vmatprep.subr.msk.mxu1 %vm246_vm1, %v258_v18 }
 0x19f   :  { %1546 = vmatpush3.xpose.msk.msra.mxu1 %vm246_vm1, %v258_v18 }
 0x1a2   :  { %1548 = vmatmul.mubr.msk.f32.vlgmr.msra.gmra.mxu1 %vm246_vm1, %v2000_v9 }
 0x1b5   :  { %v249_v19 = vpop.xlane.xlu1 %248 }
 0x1b6   :  { %v253_v26 = vmul.f32 %v249_v19, %v2028_v22 }
 0x1b9   :  { %v252_v20 = vpop.xlane.xlu1 %251 }
 0x1ba   :  { %v254_v23 = vmul.f32 %v252_v20, %v2026_v21 }
 0x262   :  { %v1549_v25 = vpop.f32.mrf.mxu1 }
 0x263   :  { %v341_v27 = vadd.f32 %v1549_v25, %v254_v23 }
 0x264   :  { %v335_v29 = vpop.f32.mrf.mxu1 }
 0x265   :  { %v345_v30 = vmul.f32 0.17677669, %v341_v27  ;;  %v336_v31 = vadd.f32 %v335_v29, %v253_v26 }
 0x267   :  { %v344_v32 = vmul.f32 0.17677669, %v336_v31  ;;  %v347_v33 = vsel %vm146_vm2, %v345_v30, -1e+30 }
 0x268   :  { %v352_v34 = vsel %vm348_vm3, %v347_v33, -inf }
 0x269   :  { %353 = vmax.xlane.f32.xlu1 %v352_v34  ;;  %v346_v35 = vsel %vm145_vm4, %v344_v32, -1e+30 }
 0x26a   :  { %v349_v36 = vsel %vm348_vm3, %v346_v35, -inf }
 0x26b   :  { %350 = vmax.xlane.f32.xlu0 %v349_v36 }
 0x27a   :  { %387 = vrot.lane.b32.xlu1 %v2000_v9, %s1883_s9 }
 0x281   :  { %483 = vrot.lane.b32.xlu0 %v481_v38, %s1882_s0 }
 0x2f2   :  { %v354_v39 = vpop.xlane.xlu1 %353 }
 0x2f3   :  { %v356_v40 = vsub.f32 %v347_v33, %v354_v39 }
 0x2f4   :  { %v351_v41 = vpop.xlane.xlu0 %350 }
 0x2f5   :  { %v359_v42 = vmul.f32 1.442695, %v356_v40  ;;  %v355_v43 = vsub.f32 %v346_v35, %v351_v41 }
 0x2f6   :  { %v388_v44 = vpop.permute.xlu1 %387 }
 0x2f7   :  { %1624 = vpow2.f32 %v359_v42  ;;  %v357_v45 = vmul.f32 1.442695, %v355_v43  ;;  %1550 = vmatprep.subr.mxu0 %v388_v44 }
 0x2f8   :  { %1551 = vmatpush3.msra.mxu0 %v388_v44  ;;  %v484_v1 = vpop.permute.xlu0 %483 }
 0x2f9   :  { %1626 = vpow2.f32 %v357_v45  ;;  %v486_v2 = vmul.f32 %v484_v1, %v2002_v11  ;;  %v487_v3 = vmul.f32 %v484_v1, %v2000_v9 }
 0x304   :  { %v1625_v46 = vpop.eup %1624 }
 0x305   :  { %v362_v47 = vsel %vm146_vm2, %v1625_v46, 0.0 }
 0x306   :  { %v1627_v48 = vpop.eup %1626  ;;  %v366_v49 = vsel %vm348_vm3, %v362_v47, 0.0 }
 0x307   :  { %367 = vadd.xlane.f32.xlu1 %v366_v49  ;;  %v361_v50 = vsel %vm145_vm4, %v1627_v48, 0.0 }
 0x308   :  { %v363_v51 = vsel %vm348_vm3, %v361_v50, 0.0 }
 0x30b   :  { %364 = vadd.xlane.f32.xlu1 %v363_v51 }
 0x31c   :  { %385 = vrot.lane.b32.xlu1 %v2002_v11, %s1883_s9 }
 0x390   :  { %v368_v52 = vpop.xlane.xlu1 %367 }
 0x391   :  { %v370_v53 = vmax.f32 %v368_v52, 1e-16 }
 0x393   :  { %1628 = vrcp.f32 %v370_v53 }
 0x394   :  { %v365_v54 = vpop.xlane.xlu1 %364 }
 0x395   :  { %v369_v55 = vmax.f32 %v365_v54, 1e-16 }
 0x397   :  { %1630 = vrcp.f32 %v369_v55 }
 0x398   :  { %v386_v56 = vpop.permute.xlu1 %385 }
 0x399   :  { %1552 = vmatprep.subr.mxu0 %v386_v56 }
 0x39a   :  { %1553 = vmatpush3.msra.mxu0 %v386_v56 }
 0x3a0   :  { %v1629_v57 = vpop.eup %1628 }
 0x3a1   :  { %v374_v58 = vmul.f32 %v1629_v57, %v362_v47 }
 0x3a3   :  { %v376_v59 = vmul.f32 %v374_v58, %v2026_v21 }
 0x3a4   :  { %v1631_v60 = vpop.eup %1630 }
 0x3a5   :  { %v380_v61 = vsel %vm348_vm3, %v376_v59, 0.0  ;;  %v373_v62 = vmul.f32 %v1631_v60, %v361_v50 }
 0x3a6   :  { %381 = vadd.xlane.f32.xlu0 %v380_v61 }
 0x3a7   :  { %1554 = vmatprep.mubr.msk.f32.mxu0 %vm348_vm3, %v373_v62  ;;  %v375_v63 = vmul.f32 %v373_v62, %v2028_v22 }
 0x3a8   :  { %1555 = vmatmul.mubr.msk.f32.vlgmr.msra.gmra.mxu0 %vm348_vm3, %v374_v58 }
 0x3a9   :  { %v377_v0 = vsel %vm348_vm3, %v375_v63, 0.0 }
 0x3aa   :  { %378 = vadd.xlane.f32.xlu1 %v377_v0 }
 0x3bb   :  { %490 = vrot.lane.b32.xlu1 %v486_v2, %s1884_s28  ;;  %v577_v2 = vsub.s32 1, %v1993_v4 }
 0x3bc   :  { %492 = vrot.lane.b32.xlu0 %v487_v3, %s1884_s28 }
 0x3bd   :  { %v578_v3 = vrot.slane %v1998_v8, %v577_v2 }
 0x42f   :  { %v382_v7 = vpop.xlane.xlu0 %381 }
 0x430   :  { %v384_v13 = vmul.f32 %v382_v7, %v2008_v12  ;;  %v587_v7 = vsub.s32 2, %v1993_v4 }
 0x433   :  { %v379_v10 = vpop.xlane.xlu1 %378  ;;  %v493_v23 = vpop.permute.xlu0 %492 }
 0x434   :  { %v383_v16 = vmul.f32 %v379_v10, %v2008_v12  ;;  %v588_v10 = vrot.slane %v1998_v8, %v587_v7 }
 0x437   :  { %v491_v27 = vpop.permute.xlu1 %490 }
 0x468   :  { %v1556_v15 = vpop.f32.mrf.mxu0 }
 0x469   :  { %v469_v17 = vadd.f32 %v1556_v15, %v384_v13  ;;  %v600_v13 = vld [vmem:[%s2295_s6 + $0x18] sm:$0xff] }
 0x46a   :  { %v463_v18 = vpop.f32.mrf.mxu0  ;;  %1557 = vmatprep.subr.mxu0 %v600_v13 }
 0x46b   :  { %v477_v19 = vmul.f32 %v475_v14, %v469_v17  ;;  %v464_v20 = vadd.f32 %v463_v18, %v383_v16  ;;  %1558 = vmatpush3.msra.mxu0 %v600_v13 }
 0x46d   :  { %v476_v25 = vmul.f32 %v475_v14, %v464_v20  ;;  %v497_v26 = vadd.f32 %v493_v23, %v477_v19  ;;  %v599_v14 = vld [vmem:[%s2295_s6 + $0x10] sm:$0xff]  ;;  %v597_v23 = vld [vmem:[%s2295_s6] sm:$0xff] }
 0x46e   :  { %1559 = vmatprep.subr.mxu0 %v599_v14 }
 0x46f   :  { %v501_v29 = vsel %vm246_vm1, %v497_v26, 0.0  ;;  %v496_v30 = vadd.f32 %v491_v27, %v476_v25  ;;  %1560 = vmatpush3.msra.mxu0 %v599_v14 }
 0x470   :  { %502 = vadd.xlane.f32.xlu0 %v501_v29 }
 0x471   :  { %v498_v31 = vsel %vm246_vm1, %v496_v30, 0.0 }
 0x472   :  { %499 = vadd.xlane.f32.xlu1 %v498_v31 }
 0x4f9   :  { %v503_v32 = vpop.xlane.xlu0 %502 }
 0x4fa   :  { %v1476_v33 = vmul.f32 -1.442695, %v503_v32 }
 0x4fb   :  { %v500_v34 = vpop.xlane.xlu1 %499 }
 0x4fc   :  { %1632 = vpow2.f32 %v1476_v33  ;;  %v1475_v12 = vmul.f32 -1.442695, %v500_v34 }
 0x4fe   :  { %1634 = vpow2.f32 %v1475_v12 }
 0x509   :  { %v1633_v35 = vpop.eup %1632 }
 0x50a   :  { %v511_v36 = vadd.f32 1.0, %v1633_v35 }
 0x50b   :  { %v1635_v38 = vpop.eup %1634 }
 0x50c   :  { %1636 = vrcp.f32 %v511_v36  ;;  %v510_v39 = vadd.f32 1.0, %v1635_v38 }
 0x50e   :  { %1638 = vrcp.f32 %v510_v39 }
 0x519   :  { %v1637_v40 = vpop.eup %1636 }
 0x51a   :  { %v519_v41 = vsub.f32 1.0, %v1637_v40  ;;  %v517_v50 = vmul.f32 %v1637_v40, %v2000_v9  ;;  %v1477_v40 = vld [vmem:[#allocation11] ss:$0 sm:$0xff] }
 0x51b   :  { %v1639_v42 = vpop.eup %1638 }
 0x51c   :  { %v521_v43 = vmul.f32 %v519_v41, %v469_v17  ;;  %v518_v44 = vsub.f32 1.0, %v1639_v42  ;;  %v516_v46 = vmul.f32 %v1639_v42, %v2002_v11 }
 0x51e   :  { %526 = vrot.lane.b32.xlu0 %v521_v43, %s1882_s0  ;;  %v520_v45 = vmul.f32 %v518_v44, %v464_v20  ;;  %v598_v20 = vld [vmem:[%s2295_s6 + $0x8] sm:$0xff] }
 0x51f   :  { %1561 = vmatprep.subr.mxu0 %v598_v20 }
 0x520   :  { %524 = vrot.lane.b32.xlu1 %v520_v45, %s1882_s0  ;;  %1562 = vmatpush3.msra.mxu0 %v598_v20  ;;  %v2127_v45 = vld [vmem:[#allocation13] sm:$0xff] }
 0x521   :  { %1563 = vmatprep.subr.mxu0 %v597_v23 }
 0x522   :  { %1564 = vmatpush3.msra.mxu0 %v597_v23  ;;  %v933_v23 = vrot.slane %v2127_v45, %v2045_v37 }
 0x590   :  { %v527_v49 = vpop.permute.xlu0 %526 }
 0x591   :  { %v531_v51 = vadd.f32 %v527_v49, %v517_v50 }
 0x592   :  { %v525_v47 = vpop.permute.xlu1 %524 }
 0x593   :  { %v530_v48 = vadd.f32 %v525_v47, %v516_v46  ;;  %v2131_v46 = vrot.slane %v2127_v45, %v1996_v6 }
 0x595   :  { %534 = vrot.lane.b32.xlu1 %v530_v48, %s1884_s28 }
 0x599   :  { %536 = vrot.lane.b32.xlu1 %v531_v51, %s1884_s28 }
 0x607   :  { %v535_v52 = vpop.permute.xlu1 %534 }
 0x608   :  { %v540_v53 = vsel %vm246_vm1, %v535_v52, 0.0 }
 0x609   :  { %541 = vadd.xlane.f32.xlu1 %v540_v53 }
 0x60b   :  { %v537_v54 = vpop.permute.xlu1 %536 }
 0x60c   :  { %v543_v55 = vsel %vm246_vm1, %v537_v54, 0.0 }
 0x60d   :  { %544 = vadd.xlane.f32.xlu0 %v543_v55 }
 0x692   :  { %v542_v56 = vpop.xlane.xlu1 %541 }
 0x693   :  { %v547_v11 = vmul.f32 0.03125, %v542_v56 }
 0x695   :  { %v549_v57 = vsub.f32 %v530_v48, %v547_v11 }
 0x696   :  { %v545_v58 = vpop.xlane.xlu0 %544 }
 0x697   :  { %v548_v59 = vmul.f32 0.03125, %v545_v58  ;;  %v551_v60 = vmul.f32 %v549_v57, %v549_v57 }
 0x699   :  { %v550_v9 = vsub.f32 %v531_v51, %v548_v59  ;;  %555 = vrot.lane.b32.xlu1 %v551_v60, %s1884_s28 }
 0x69b   :  { %v552_v61 = vmul.f32 %v550_v9, %v550_v9 }
 0x69d   :  { %557 = vrot.lane.b32.xlu0 %v552_v61, %s1884_s28 }
 0x70b   :  { %v556_v62 = vpop.permute.xlu1 %555 }
 0x70c   :  { %v561_v63 = vsel %vm246_vm1, %v556_v62, 0.0 }
 0x70d   :  { %562 = vadd.xlane.f32.xlu1 %v561_v63 }
 0x70f   :  { %v558_v0 = vpop.permute.xlu0 %557 }
 0x710   :  { %v564_v1 = vsel %vm246_vm1, %v558_v0, 0.0 }
 0x711   :  { %565 = vadd.xlane.f32.xlu0 %v564_v1 }
 0x71e   :  { %580 = vrot.lane.b32.xlu1 %v578_v3, %s1882_s0 }
 0x727   :  { %590 = vrot.lane.b32.xlu0 %v588_v10, %s1882_s0 }
 0x796   :  { %v563_v15 = vpop.xlane.xlu1 %562 }
 0x797   :  { %v567_v16 = vmul.f32 0.03125, %v563_v15 }
 0x799   :  { %v569_v17 = vadd.f32 1e-05, %v567_v16 }
 0x79a   :  { %v566_v18 = vpop.xlane.xlu0 %565  ;;  %v581_v26 = vpop.permute.xlu1 %580 }
 0x79b   :  { %1640 = vrsqrt.f32 %v569_v17  ;;  %v568_v8 = vmul.f32 0.03125, %v566_v18 }
 0x79d   :  { %v570_v19 = vadd.f32 1e-05, %v568_v8 }
 0x79e   :  { %v591_v29 = vpop.permute.xlu0 %590 }
 0x79f   :  { %1642 = vrsqrt.f32 %v570_v19 }
 0x7a8   :  { %v1641_v25 = vpop.eup %1640 }
 0x7a9   :  { %v573_v27 = vmul.f32 %v1641_v25, %v549_v57 }
 0x7ab   :  { %v583_v30 = vmul.f32 %v581_v26, %v573_v27 }
 0x7ac   :  { %v1643_v31 = vpop.eup %1642 }
 0x7ad   :  { %v574_v32 = vmul.f32 %v1643_v31, %v550_v9  ;;  %v593_v33 = vadd.f32 %v591_v29, %v583_v30 }
 0x7af   :  { %v584_v34 = vmul.f32 %v581_v26, %v574_v32  ;;  %v595_v12 = vmax.f32 %v593_v33, 0.0 }
 0x7b1   :  { %v594_v35 = vadd.f32 %v591_v29, %v584_v34  ;;  %610 = vrot.lane.b32.xlu1 %v595_v12, %s1884_s28 }
 0x7b3   :  { %v596_v36 = vmax.f32 %v594_v35, 0.0 }
 0x7b5   :  { %612 = vrot.lane.b32.xlu1 %v596_v36, %s1884_s28 }
 0x823   :  { %v611_v38 = vpop.permute.xlu1 %610 }
 0x824   :  { %1565 = vmatprep.mubr.msk.f32.mxu0 %vm246_vm1, %v611_v38 }
 0x827   :  { %v613_v39 = vpop.permute.xlu1 %612 }
 0x828   :  { %1566 = vmatmul.mubr.msk.f32.vlgmr.msra.gmra.mxu0 %vm246_vm1, %v613_v39 }
 0x8e8   :  { %v1567_v41 = vpop.f32.mrf.mxu0 }
 0x8e9   :  { %v2117_v42 = vadd.f32 %v1567_v41, %v1477_v40 }
 0x8ea   :  { %v684_v43 = vpop.f32.mrf.mxu0 }
 0x8eb   :  { %v2119_v44 = vadd.f32 %v1477_v40, %v684_v43  ;;  %712 = vrot.lane.b32.xlu1 %v2117_v42, %s1882_s0  ;;  %v699_v47 = vmul.f32 %v2131_v46, %v2117_v42 }
 0x8ed   :  { %710 = vrot.lane.b32.xlu0 %v2119_v44, %s1882_s0  ;;  %1572 = vmatprep.mubr.msk.f32.mxu1 %vm246_vm1, %v2119_v44  ;;  %v698_v48 = vmul.f32 %v2131_v46, %v2119_v44  ;;  %v703_v49 = vsel %vm246_vm1, %v699_v47, 0.0 }
 0x8ef   :  { %v700_v50 = vsel %vm246_vm1, %v698_v48, 0.0 }
 0x90c   :  { %704 = vadd.xlane.f32.xlu0 %v703_v49 }
 0x90f   :  { %701 = vadd.xlane.f32.xlu1 %v700_v50  ;;  %v927_v50 = vrot.slane %v2127_v45, %v2071_v5 }
 0x95d   :  { %v713_v51 = vpop.permute.xlu1 %712 }
 0x95e   :  { %1568 = vmatprep.subr.msk.mxu1 %vm246_vm1, %v713_v51 }
 0x95f   :  { %1569 = vmatpush3.xpose.msk.msra.mxu1 %vm246_vm1, %v713_v51  ;;  %v711_v52 = vpop.permute.xlu0 %710 }
 0x960   :  { %1570 = vmatprep.subr.msk.mxu1 %vm246_vm1, %v711_v52 }
 0x963   :  { %1571 = vmatpush3.xpose.msk.msra.mxu1 %vm246_vm1, %v711_v52 }
 0x966   :  { %1573 = vmatmul.mubr.msk.f32.vlgmr.msra.gmra.mxu1 %vm246_vm1, %v2117_v42 }
 0x995   :  { %v705_v53 = vpop.xlane.xlu0 %704 }
 0x996   :  { %v707_v55 = vmul.f32 %v705_v53, %v2026_v21 }
 0x998   :  { %v702_v54 = vpop.xlane.xlu1 %701 }
 0x999   :  { %v706_v11 = vmul.f32 %v702_v54, %v2028_v22 }
 0xa26   :  { %v1574_v56 = vpop.f32.mrf.mxu1 }
 0xa27   :  { %v794_v57 = vadd.f32 %v1574_v56, %v707_v55 }
 0xa28   :  { %v788_v58 = vpop.f32.mrf.mxu1 }
 0xa29   :  { %v798_v59 = vmul.f32 0.17677669, %v794_v57  ;;  %v789_v60 = vadd.f32 %v788_v58, %v706_v11 }
 0xa2b   :  { %v797_v9 = vmul.f32 0.17677669, %v789_v60  ;;  %v800_v61 = vsel %vm146_vm2, %v798_v59, -1e+30 }
 0xa2c   :  { %v804_v62 = vsel %vm348_vm3, %v800_v61, -inf }
 0xa2d   :  { %805 = vmax.xlane.f32.xlu1 %v804_v62  ;;  %v799_v63 = vsel %vm145_vm4, %v797_v9, -1e+30 }
 0xa2e   :  { %v801_v0 = vsel %vm348_vm3, %v799_v63, -inf }
 0xa2f   :  { %802 = vmax.xlane.f32.xlu0 %v801_v0 }
 0xab6   :  { %v806_v1 = vpop.xlane.xlu1 %805 }
 0xab7   :  { %v808_v3 = vsub.f32 %v800_v61, %v806_v1 }
 0xab8   :  { %v803_v10 = vpop.xlane.xlu0 %802 }
 0xab9   :  { %v811_v13 = vmul.f32 1.442695, %v808_v3  ;;  %v807_v14 = vsub.f32 %v799_v63, %v803_v10 }
 0xabb   :  { %1644 = vpow2.f32 %v811_v13  ;;  %v809_v15 = vmul.f32 1.442695, %v807_v14 }
 0xabd   :  { %1646 = vpow2.f32 %v809_v15 }
 0xac8   :  { %v1645_v16 = vpop.eup %1644 }
 0xac9   :  { %v814_v17 = vsel %vm146_vm2, %v1645_v16, 0.0 }
 0xaca   :  { %v1647_v18 = vpop.eup %1646  ;;  %v818_v8 = vsel %vm348_vm3, %v814_v17, 0.0 }
 0xacb   :  { %819 = vadd.xlane.f32.xlu1 %v818_v8  ;;  %v813_v19 = vsel %vm145_vm4, %v1647_v18, 0.0 }
 0xacc   :  { %v815_v20 = vsel %vm348_vm3, %v813_v19, 0.0 }
 0xacd   :  { %816 = vadd.xlane.f32.xlu0 %v815_v20 }
 0xadc   :  { %837 = vrot.lane.b32.xlu1 %v2119_v44, %s1883_s9 }
 0xae0   :  { %935 = vrot.lane.b32.xlu1 %v933_v23, %s1882_s0 }
 0xae3   :  { %839 = vrot.lane.b32.xlu0 %v2117_v42, %s1883_s9 }
 0xb54   :  { %v820_v25 = vpop.xlane.xlu1 %819 }
 0xb55   :  { %v822_v26 = vmax.f32 %v820_v25, 1e-16 }
 0xb56   :  { %v817_v27 = vpop.xlane.xlu0 %816 }
 0xb57   :  { %1648 = vrcp.f32 %v822_v26  ;;  %v821_v29 = vmax.f32 %v817_v27, 1e-16 }
 0xb58   :  { %v838_v31 = vpop.permute.xlu1 %837 }
 0xb59   :  { %1650 = vrcp.f32 %v821_v29 }
 0xb5a   :  { %v840_v30 = vpop.permute.xlu0 %839 }
 0xb5b   :  { %1575 = vmatprep.subr.mxu0 %v840_v30 }
 0xb5c   :  { %1576 = vmatpush3.msra.mxu0 %v840_v30  ;;  %v936_v40 = vpop.permute.xlu1 %935 }
 0xb5d   :  { %1577 = vmatprep.subr.mxu0 %v838_v31  ;;  %v939_v41 = vmul.f32 %v936_v40, %v2117_v42  ;;  %v938_v43 = vmul.f32 %v936_v40, %v2119_v44 }
 0xb5e   :  { %1578 = vmatpush3.msra.mxu0 %v838_v31 }
 0xb64   :  { %v1649_v32 = vpop.eup %1648 }
 0xb65   :  { %v826_v33 = vmul.f32 %v1649_v32, %v814_v17 }
 0xb66   :  { %v1651_v34 = vpop.eup %1650 }
 0xb67   :  { %v825_v12 = vmul.f32 %v1651_v34, %v813_v19  ;;  %v828_v35 = vmul.f32 %v826_v33, %v2026_v21 }
 0xb69   :  { %1579 = vmatprep.mubr.msk.f32.mxu0 %vm348_vm3, %v825_v12  ;;  %v832_v36 = vsel %vm348_vm3, %v828_v35, 0.0  ;;  %v827_v38 = vmul.f32 %v825_v12, %v2028_v22 }
 0xb6a   :  { %833 = vadd.xlane.f32.xlu1 %v832_v36  ;;  %1580 = vmatmul.mubr.msk.f32.vlgmr.msra.gmra.mxu0 %vm348_vm3, %v826_v33 }
 0xb6b   :  { %v829_v39 = vsel %vm348_vm3, %v827_v38, 0.0 }
 0xb6c   :  { %830 = vadd.xlane.f32.xlu0 %v829_v39 }
 0xb7b   :  { %944 = vrot.lane.b32.xlu1 %v939_v41, %s1884_s28 }
 0xb82   :  { %942 = vrot.lane.b32.xlu0 %v938_v43, %s1884_s28 }
 0xbf3   :  { %v834_v47 = vpop.xlane.xlu1 %833 }
 0xbf4   :  { %v836_v49 = vmul.f32 %v834_v47, %v2131_v46  ;;  %v1039_v47 = vrot.slane %v2127_v45, %v587_v7 }
 0xbf5   :  { %v831_v48 = vpop.xlane.xlu0 %830 }
 0xbf6   :  { %v835_v52 = vmul.f32 %v831_v48, %v2131_v46  ;;  %v1029_v48 = vrot.slane %v2127_v45, %v577_v2  ;;  %v1048_v2 = vld [vmem:[#allocation14] sm:$0xff] }
 0xbf7   :  { %v945_v11 = vpop.permute.xlu1 %944 }
 0xbf9   :  { %v943_v59 = vpop.permute.xlu0 %942 }
 0xc2a   :  { %v1581_v51 = vpop.f32.mrf.mxu0 }
 0xc2b   :  { %v921_v53 = vadd.f32 %v1581_v51, %v836_v49  ;;  %v1051_v49 = vld [vmem:[#allocation14 + $0x18] sm:$0xff]  ;;  %v1049_v51 = vld [vmem:[#allocation14 + $0x8] sm:$0xff] }
 0xc2c   :  { %v915_v54 = vpop.f32.mrf.mxu0  ;;  %1582 = vmatprep.subr.mxu1 %v1051_v49 }
 0xc2d   :  { %v929_v55 = vmul.f32 %v927_v50, %v921_v53  ;;  %v916_v56 = vadd.f32 %v915_v54, %v835_v52  ;;  %1583 = vmatpush3.msra.mxu1 %v1051_v49 }
 0xc2f   :  { %v928_v57 = vmul.f32 %v927_v50, %v916_v56  ;;  %v949_v58 = vadd.f32 %v945_v11, %v929_v55  ;;  %v1050_v50 = vld [vmem:[#allocation14 + $0x10] sm:$0xff] }
 0xc30   :  { %1584 = vmatprep.subr.mxu1 %v1050_v50 }
 0xc31   :  { %v953_v60 = vsel %vm246_vm1, %v949_v58, 0.0  ;;  %v948_v9 = vadd.f32 %v943_v59, %v928_v57  ;;  %1585 = vmatpush3.msra.mxu1 %v1050_v50 }
 0xc32   :  { %954 = vadd.xlane.f32.xlu1 %v953_v60  ;;  %1586 = vmatprep.subr.mxu1 %v1049_v51 }
 0xc33   :  { %v950_v61 = vsel %vm246_vm1, %v948_v9, 0.0  ;;  %1587 = vmatpush3.msra.mxu1 %v1049_v51 }
 0xc34   :  { %951 = vadd.xlane.f32.xlu0 %v950_v61  ;;  %1588 = vmatprep.subr.mxu1 %v1048_v2 }
 0xc35   :  { %1589 = vmatpush3.msra.mxu1 %v1048_v2 }
 0xcbb   :  { %v955_v62 = vpop.xlane.xlu1 %954 }
 0xcbc   :  { %v1487_v63 = vmul.f32 -1.442695, %v955_v62 }
 0xcbd   :  { %v952_v0 = vpop.xlane.xlu0 %951 }
 0xcbe   :  { %1652 = vpow2.f32 %v1487_v63  ;;  %v1486_v46 = vmul.f32 -1.442695, %v952_v0 }
 0xcc0   :  { %1654 = vpow2.f32 %v1486_v46 }
 0xccb   :  { %v1653_v1 = vpop.eup %1652 }
 0xccc   :  { %v963_v3 = vadd.f32 1.0, %v1653_v1 }
 0xccd   :  { %v1655_v10 = vpop.eup %1654 }
 0xcce   :  { %1656 = vrcp.f32 %v963_v3  ;;  %v962_v13 = vadd.f32 1.0, %v1655_v10  ;;  %v1488_v3 = vld [vmem:[%s2299_s10] ss:$0 sm:$0xff]  ;;  %s1886_s10 = smov 48  }
 0xcd0   :  { %1658 = vrcp.f32 %v962_v13 }
 0xcdb   :  { %v1657_v14 = vpop.eup %1656 }
 0xcdc   :  { %v971_v15 = vsub.f32 1.0, %v1657_v14  ;;  %v969_v19 = vmul.f32 %v1657_v14, %v2117_v42 }
 0xcdd   :  { %v1659_v16 = vpop.eup %1658 }
 0xcde   :  { %v973_v17 = vmul.f32 %v971_v15, %v921_v53  ;;  %v970_v18 = vsub.f32 1.0, %v1659_v16  ;;  %v968_v25 = vmul.f32 %v1659_v16, %v2119_v44  ;;  %v2220_v16 = vld [vmem:[%s2300_s11] sm:$0xff]  ;;  %s1887_s11 = smov 80  }
 0xce0   :  { %978 = vrot.lane.b32.xlu1 %v973_v17, %s1882_s0  ;;  %v972_v8 = vmul.f32 %v970_v18, %v916_v56  ;;  %v2224_v17 = vrot.slane %v2220_v16, %v1996_v6 }
 0xce2   :  { %976 = vrot.lane.b32.xlu0 %v972_v8, %s1882_s0 }
 0xd52   :  { %v979_v20 = vpop.permute.xlu1 %978 }
 0xd53   :  { %v983_v23 = vadd.f32 %v979_v20, %v969_v19 }
 0xd54   :  { %v977_v26 = vpop.permute.xlu0 %976 }
 0xd55   :  { %v982_v27 = vadd.f32 %v977_v26, %v968_v25  ;;  %988 = vrot.lane.b32.xlu1 %v983_v23, %s1884_s28 }
 0xd57   :  { %986 = vrot.lane.b32.xlu0 %v982_v27, %s1884_s28 }
 0xdc7   :  { %v989_v29 = vpop.permute.xlu1 %988 }
 0xdc8   :  { %v995_v30 = vsel %vm246_vm1, %v989_v29, 0.0 }
 0xdc9   :  { %v987_v31 = vpop.permute.xlu0 %986  ;;  %996 = vadd.xlane.f32.xlu1 %v995_v30 }
 0xdca   :  { %v992_v32 = vsel %vm246_vm1, %v987_v31, 0.0 }
 0xdcb   :  { %993 = vadd.xlane.f32.xlu0 %v992_v32 }
 0xe52   :  { %v997_v33 = vpop.xlane.xlu1 %996 }
 0xe53   :  { %v999_v42 = vmul.f32 0.03125, %v997_v33 }
 0xe54   :  { %v994_v34 = vpop.xlane.xlu0 %993 }
 0xe55   :  { %v1001_v12 = vsub.f32 %v983_v23, %v999_v42  ;;  %v998_v35 = vmul.f32 0.03125, %v994_v34 }
 0xe57   :  { %v1000_v44 = vsub.f32 %v982_v27, %v998_v35  ;;  %v1003_v36 = vmul.f32 %v1001_v12, %v1001_v12 }
 0xe59   :  { %1008 = vrot.lane.b32.xlu1 %v1003_v36, %s1884_s28  ;;  %v1002_v38 = vmul.f32 %v1000_v44, %v1000_v44 }
 0xe5b   :  { %1006 = vrot.lane.b32.xlu0 %v1002_v38, %s1884_s28 }
 0xecb   :  { %v1009_v39 = vpop.permute.xlu1 %1008 }
 0xecc   :  { %v1015_v40 = vsel %vm246_vm1, %v1009_v39, 0.0 }
 0xecd   :  { %v1007_v41 = vpop.permute.xlu0 %1006  ;;  %1016 = vadd.xlane.f32.xlu1 %v1015_v40 }
 0xece   :  { %v1012_v43 = vsel %vm246_vm1, %v1007_v41, 0.0 }
 0xecf   :  { %1013 = vadd.xlane.f32.xlu0 %v1012_v43 }
 0xede   :  { %1041 = vrot.lane.b32.xlu1 %v1039_v47, %s1882_s0 }
 0xee5   :  { %1031 = vrot.lane.b32.xlu0 %v1029_v48, %s1882_s0 }
 0xf56   :  { %v1017_v52 = vpop.xlane.xlu1 %1016 }
 0xf57   :  { %v1019_v53 = vmul.f32 0.03125, %v1017_v52 }
 0xf58   :  { %v1014_v7 = vpop.xlane.xlu0 %1013 }
 0xf59   :  { %v1021_v54 = vadd.f32 1e-05, %v1019_v53  ;;  %v1018_v55 = vmul.f32 0.03125, %v1014_v7  ;;  %v1384_v7 = vrot.slane %v2220_v16, %v2045_v37 }
 0xf5a   :  { %v1042_v58 = vpop.permute.xlu1 %1041 }
 0xf5b   :  { %1660 = vrsqrt.f32 %v1021_v54  ;;  %v1020_v4 = vadd.f32 1e-05, %v1018_v55 }
 0xf5c   :  { %v1032_v56 = vpop.permute.xlu0 %1031 }
 0xf5d   :  { %1662 = vrsqrt.f32 %v1020_v4 }
 0xf68   :  { %v1661_v45 = vpop.eup %1660 }
 0xf69   :  { %v1025_v11 = vmul.f32 %v1661_v45, %v1001_v12 }
 0xf6a   :  { %v1663_v57 = vpop.eup %1662 }
 0xf6b   :  { %v1024_v59 = vmul.f32 %v1663_v57, %v1000_v44  ;;  %v1035_v60 = vmul.f32 %v1032_v56, %v1025_v11 }
 0xf6d   :  { %v1034_v9 = vmul.f32 %v1032_v56, %v1024_v59  ;;  %v1045_v61 = vadd.f32 %v1042_v58, %v1035_v60 }
 0xf6f   :  { %v1044_v62 = vadd.f32 %v1042_v58, %v1034_v9  ;;  %v1047_v63 = vmax.f32 %v1045_v61, 0.0 }
 0xf71   :  { %v1046_v0 = vmax.f32 %v1044_v62, 0.0  ;;  %1063 = vrot.lane.b32.xlu1 %v1047_v63, %s1884_s28 }
 0xf73   :  { %1061 = vrot.lane.b32.xlu0 %v1046_v0, %s1884_s28 }
 0xfe3   :  { %v1064_v1 = vpop.permute.xlu1 %1063 }
 0xfe5   :  { %v1062_v46 = vpop.permute.xlu0 %1061 }
 0xfe6   :  { %1590 = vmatprep.mubr.msk.f32.mxu1 %vm246_vm1, %v1062_v46 }
 0xfe7   :  { %1591 = vmatmul.mubr.msk.f32.vlgmr.msra.gmra.mxu1 %vm246_vm1, %v1064_v1 }
0x10a7   :  { %v1592_v10 = vpop.f32.mrf.mxu1 }
0x10a8   :  { %v2209_v13 = vadd.f32 %v1592_v10, %v1488_v3 }
0x10a9   :  { %v1135_v14 = vpop.f32.mrf.mxu1 }
0x10aa   :  { %v2211_v15 = vadd.f32 %v1488_v3, %v1135_v14  ;;  %1163 = vrot.lane.b32.xlu0 %v2209_v13, %s1885_s18  ;;  %v1150_v19 = vmul.f32 %v2224_v17, %v2209_v13 }
0x10ac   :  { %1161 = vrot.lane.b32.xlu1 %v2211_v15, %s1885_s18  ;;  %1597 = vmatprep.mubr.msk.f32.mxu0 %vm348_vm3, %v2211_v15  ;;  %v1149_v18 = vmul.f32 %v2224_v17, %v2211_v15  ;;  %v1154_v20 = vsel %vm348_vm3, %v1150_v19, 0.0 }
0x10ae   :  { %v1151_v8 = vsel %vm348_vm3, %v1149_v18, 0.0 }
0x10c9   :  { %1152 = vadd.xlane.f32.xlu0 %v1151_v8 }
0x10d0   :  { %1155 = vadd.xlane.f32.xlu1 %v1154_v20 }
0x111c   :  { %v1164_v23 = vpop.permute.xlu0 %1163 }
0x111d   :  { %1593 = vmatprep.subr.msk.mxu0 %vm348_vm3, %v1164_v23 }
0x111e   :  { %1594 = vmatpush3.xpose.msk.msra.mxu0 %vm348_vm3, %v1164_v23  ;;  %v1162_v25 = vpop.permute.xlu1 %1161 }
0x111f   :  { %1595 = vmatprep.subr.msk.mxu0 %vm348_vm3, %v1162_v25 }
0x1122   :  { %1596 = vmatpush3.xpose.msk.msra.mxu0 %vm348_vm3, %v1162_v25 }
0x1125   :  { %1598 = vmatmul.mubr.msk.f32.vlgmr.msra.gmra.mxu0 %vm348_vm3, %v2209_v13 }
0x1152   :  { %v1153_v26 = vpop.xlane.xlu0 %1152 }
0x1153   :  { %v1157_v30 = vmul.f32 %v1153_v26, %v2028_v22 }
0x1159   :  { %v1156_v6 = vpop.xlane.xlu1 %1155 }
0x115a   :  { %v1158_v27 = vmul.f32 %v1156_v6, %v2026_v21 }
0x11e5   :  { %v1599_v29 = vpop.f32.mrf.mxu0 }
0x11e6   :  { %v1245_v31 = vadd.f32 %v1599_v29, %v1158_v27 }
0x11e7   :  { %v1239_v32 = vpop.f32.mrf.mxu0 }
0x11e8   :  { %v1240_v33 = vadd.f32 %v1239_v32, %v1157_v30  ;;  %v1249_v42 = vmul.f32 0.25, %v1245_v31 }
0x11ea   :  { %v1248_v34 = vmul.f32 0.25, %v1240_v33  ;;  %v1251_v44 = vsel %vm146_vm2, %v1249_v42, -1e+30 }
0x11eb   :  { %v1255_v36 = vsel %vm348_vm3, %v1251_v44, -inf }
0x11ec   :  { %v1250_v12 = vsel %vm145_vm4, %v1248_v34, -1e+30 }
0x11ed   :  { %v1252_v35 = vsel %vm348_vm3, %v1250_v12, -inf }
0x11ee   :  { %1253 = vmax.xlane.f32.xlu0 %v1252_v35 }
0x11f2   :  { %1256 = vmax.xlane.f32.xlu0 %v1255_v36 }
0x1277   :  { %v1254_v38 = vpop.xlane.xlu0 %1253 }
0x1278   :  { %v1258_v39 = vsub.f32 %v1250_v12, %v1254_v38 }
0x127a   :  { %v1260_v40 = vmul.f32 1.442695, %v1258_v39 }
0x127b   :  { %v1257_v41 = vpop.xlane.xlu0 %1256 }
0x127c   :  { %1664 = vpow2.f32 %v1260_v40  ;;  %v1259_v43 = vsub.f32 %v1251_v44, %v1257_v41 }
0x127e   :  { %v1262_v47 = vmul.f32 1.442695, %v1259_v43 }
0x1280   :  { %1666 = vpow2.f32 %v1262_v47 }
0x1289   :  { %v1665_v48 = vpop.eup %1664 }
0x128a   :  { %v1264_v49 = vsel %vm145_vm4, %v1665_v48, 0.0 }
0x128b   :  { %v1266_v50 = vsel %vm348_vm3, %v1264_v49, 0.0 }
0x128c   :  { %1267 = vadd.xlane.f32.xlu1 %v1266_v50 }
0x128d   :  { %v1667_v51 = vpop.eup %1666 }
0x128e   :  { %v1265_v52 = vsel %vm146_vm2, %v1667_v51, 0.0 }
0x128f   :  { %v1269_v53 = vsel %vm348_vm3, %v1265_v52, 0.0 }
0x1290   :  { %1270 = vadd.xlane.f32.xlu0 %v1269_v53 }
0x129d   :  { %1290 = vrot.lane.b32.xlu1 %v2209_v13, %s1882_s0 }
0x12a1   :  { %1386 = vrot.lane.b32.xlu1 %v1384_v7, %s1886_s10 }
0x12a6   :  { %1288 = vrot.lane.b32.xlu0 %v2211_v15, %s1882_s0 }
0x1315   :  { %v1268_v28 = vpop.xlane.xlu1 %1267 }
0x1316   :  { %v1272_v54 = vmax.f32 %v1268_v28, 1e-16 }
0x1318   :  { %1668 = vrcp.f32 %v1272_v54 }
0x1319   :  { %v1291_v24 = vpop.permute.xlu1 %1290  ;;  %v1271_v55 = vpop.xlane.xlu0 %1270 }
0x131a   :  { %v1273_v4 = vmax.f32 %v1271_v55, 1e-16  ;;  %1600 = vmatprep.subr.mxu1 %v1291_v24 }
0x131b   :  { %1601 = vmatpush3.msra.mxu1 %v1291_v24 }
0x131c   :  { %1670 = vrcp.f32 %v1273_v4 }
0x131d   :  { %v1289_v2 = vpop.permute.xlu0 %1288  ;;  %v1387_v9 = vpop.permute.xlu1 %1386 }
0x131e   :  { %1602 = vmatprep.subr.mxu1 %v1289_v2  ;;  %v1390_v61 = vmul.f32 %v1387_v9, %v2209_v13 }
0x131f   :  { %1603 = vmatpush3.msra.mxu1 %v1289_v2 }
0x1325   :  { %v1669_v45 = vpop.eup %1668 }
0x1326   :  { %v1276_v37 = vmul.f32 %v1669_v45, %v1264_v49 }
0x1328   :  { %1604 = vmatprep.mubr.msk.f32.mxu1 %vm348_vm3, %v1276_v37  ;;  %v1278_v56 = vmul.f32 %v1276_v37, %v2028_v22  ;;  %v1389_v22 = vmul.f32 %v1387_v9, %v2211_v15 }
0x1329   :  { %v1671_v11 = vpop.eup %1670 }
0x132a   :  { %v1280_v57 = vsel %vm348_vm3, %v1278_v56, 0.0  ;;  %v1277_v58 = vmul.f32 %v1671_v11, %v1265_v52 }
0x132b   :  { %1281 = vadd.xlane.f32.xlu1 %v1280_v57 }
0x132c   :  { %1605 = vmatmul.mubr.msk.f32.vlgmr.msra.gmra.mxu1 %vm348_vm3, %v1277_v58  ;;  %v1279_v59 = vmul.f32 %v1277_v58, %v2026_v21  ;;  %v1378_v21 = vrot.slane %v2220_v16, %v2071_v5 }
0x132e   :  { %v1283_v60 = vsel %vm348_vm3, %v1279_v59, 0.0 }
0x132f   :  { %1284 = vadd.xlane.f32.xlu0 %v1283_v60 }
0x133c   :  { %1395 = vrot.lane.b32.xlu1 %v1390_v61, %s1887_s11 }
0x1345   :  { %1393 = vrot.lane.b32.xlu0 %v1389_v22, %s1887_s11 }
0x13b4   :  { %v1282_v63 = vpop.xlane.xlu1 %1281 }
0x13b5   :  { %v1286_v1 = vmul.f32 %v1282_v63, %v2224_v17 }
0x13b8   :  { %v1285_v62 = vpop.xlane.xlu0 %1284  ;;  %v1396_v8 = vpop.permute.xlu1 %1395 }
0x13b9   :  { %v1287_v0 = vmul.f32 %v1285_v62, %v2224_v17 }
0x13bc   :  { %v1394_v23 = vpop.permute.xlu0 %1393 }
0x13ec   :  { %v1606_v46 = vpop.f32.mrf.mxu1 }
0x13ed   :  { %v1372_v3 = vadd.f32 %v1606_v46, %v1287_v0 }
0x13ee   :  { %v1366_v10 = vpop.f32.mrf.mxu1 }
0x13ef   :  { %v1380_v14 = vmul.f32 %v1378_v21, %v1372_v3  ;;  %v1367_v18 = vadd.f32 %v1366_v10, %v1286_v1 }
0x13f1   :  { %v1379_v19 = vmul.f32 %v1378_v21, %v1367_v18  ;;  %v1400_v20 = vadd.f32 %v1396_v8, %v1380_v14 }
0x13f3   :  { %v1404_v25 = vsel %vm348_vm3, %v1400_v20, 0.0  ;;  %v1399_v6 = vadd.f32 %v1394_v23, %v1379_v19 }
0x13f4   :  { %1405 = vadd.xlane.f32.xlu0 %v1404_v25 }
0x13f5   :  { %v1401_v26 = vsel %vm348_vm3, %v1399_v6, 0.0 }
0x13f6   :  { %1402 = vadd.xlane.f32.xlu1 %v1401_v26 }
0x147d   :  { %v1406_v27 = vpop.xlane.xlu0 %1405 }
0x147e   :  { %v1498_v5 = vmul.f32 -1.442695, %v1406_v27 }
0x147f   :  { %v1403_v16 = vpop.xlane.xlu1 %1402 }
0x1480   :  { %1672 = vpow2.f32 %v1498_v5  ;;  %v1497_v17 = vmul.f32 -1.442695, %v1403_v16 }
0x1482   :  { %1674 = vpow2.f32 %v1497_v17 }
0x148d   :  { %v1673_v29 = vpop.eup %1672 }
0x148e   :  { %v1414_v30 = vadd.f32 1.0, %v1673_v29 }
0x148f   :  { %v1675_v31 = vpop.eup %1674 }
0x1490   :  { %1676 = vrcp.f32 %v1414_v30  ;;  %v1413_v32 = vadd.f32 1.0, %v1675_v31 }
0x1492   :  { %1678 = vrcp.f32 %v1413_v32 }
0x149d   :  { %v1677_v33 = vpop.eup %1676 }
0x149e   :  { %v1422_v42 = vsub.f32 1.0, %v1677_v33  ;;  %v1420_v36 = vmul.f32 %v1677_v33, %v2209_v13 }
0x149f   :  { %v1679_v34 = vpop.eup %1678 }
0x14a0   :  { %v1424_v12 = vmul.f32 %v1422_v42, %v1372_v3  ;;  %v1421_v35 = vsub.f32 1.0, %v1679_v34  ;;  %v1419_v40 = vmul.f32 %v1679_v34, %v2211_v15 }
0x14a2   :  { %1429 = vrot.lane.b32.xlu1 %v1424_v12, %s1886_s10  ;;  %v1423_v44 = vmul.f32 %v1421_v35, %v1367_v18 }
0x14a4   :  { %1427 = vrot.lane.b32.xlu0 %v1423_v44, %s1886_s10 }
0x1514   :  { %v1430_v38 = vpop.permute.xlu1 %1429 }
0x1515   :  { %v1434_v39 = vadd.f32 %v1430_v38, %v1420_v36 }
0x1516   :  { %v1428_v41 = vpop.permute.xlu0 %1427 }
0x1517   :  { %v1433_v43 = vadd.f32 %v1428_v41, %v1419_v40  ;;  %1439 = vrot.lane.b32.xlu0 %v1434_v39, %s1887_s11 }
0x1519   :  { %1437 = vrot.lane.b32.xlu1 %v1433_v43, %s1887_s11 }
0x1589   :  { %v1440_v47 = vpop.permute.xlu0 %1439 }
0x158a   :  { %1444 = vst.msk [vmem:[#allocation16 + $0x8] sm:$0xff] %vm348_vm3, %v1440_v47 }
0x158b   :  { %v1438_v48 = vpop.permute.xlu1 %1437 }
0x158c   :  { %1443 = vst.msk [vmem:[#allocation16] sm:$0xff] %vm348_vm3, %v1438_v48 }
0x158d   :  { %1851 = shalt.err (!%p1848_p2)
}
0x158e   :  { %1456 = dma.vmem_to_hbm [thread:$0]  %s1451_s3, 256, %s2301_s12, [#allocation4], %s1874_s26, %s1874_s26, %s1875_s27  }
0x158f   :  { %1870 = dma.done.wait [#allocation4], 256  }
0x1590   :  { %1871 = vsyncadd [#allocation4], 4294967040 }
0x1591   :  { %1460 = vsyncpa [#allocation3], 1 }
0x1592   :  { %1461 = vsyncpa [#allocation6], 1 }
0x1593   :  { %1462 = vsyncpa [#allocation9], 1 }
0x1594   :  { %1463 = vsyncpa [#allocation12], 1 }
0x1595   :  { %1464 = vsyncpa [#allocation15], 1 }
0x1596   :  { %1465 = vsyncpa [#allocation4], 1 }

</bundles_post_ra>
